<compile_context>
chip_gen: v6e
topology: v6e:2x2x1
jax: 0.10.0
libtpu: 0.0.40
codegen_flags: <defaults>
</compile_context>

<pallas_src>
import numpy as np
import jax
import jax.numpy as jnp
from jax.experimental import pallas as pl
from jax.experimental.pallas import tpu as pltpu

# Small, module-consistent sizes: batch=2, src_len=8, d_model=32, heads=4, d_ff=64
B, S, D = 2, 8, 32
H = 4
DH = D // H
DFF = 64
EPS = 1e-6


def _fast_recip(x):
    # EUP approximate reciprocal + one Newton step: ~f32-exact (err ~ eps^2)
    # while keeping the divide sequence off the VALU slot.
    r = pl.reciprocal(x, approx=True)
    return r * (2.0 - x * r)


def _erf_approx(x):
    # Abramowitz & Stegun 7.1.26 (max abs err ~1.5e-7); avoids relying on an
    # erf lowering inside Mosaic.  Built from abs/exp/mul/add + EUP reciprocal.
    a1, a2, a3, a4, a5 = 0.254829592, -0.284496736, 1.421413741, -1.453152027, 1.061405429
    p = 0.3275911
    sgn = jnp.where(x < 0.0, -1.0, 1.0)
    ax = jnp.abs(x)
    t = _fast_recip(1.0 + p * ax)
    poly = ((((a5 * t + a4) * t + a3) * t + a2) * t + a1) * t
    y = 1.0 - poly * jnp.exp(-ax * ax)
    return sgn * y


def _gelu_exact(x):
    # PyTorch nn.GELU() default (erf-based), via the polynomial erf above.
    return 0.5 * x * (1.0 + _erf_approx(x * 0.7071067811865476))


def encoder_layer_kernel(x_ref, mbias_ref, qkvw_ref, qkvb_ref, wo_ref, vec_ref,
                         w1_ref, b1_ref, w2_ref, out_ref):
    x = x_ref[...]                    # (B*S, D) flattened activations
    vecs = vec_ref[...]               # (6, D) packed small params
    ln1_g, ln1_b = vecs[0:1], vecs[1:2]
    ln2_g, ln2_b = vecs[2:3], vecs[3:4]
    bo, b2 = vecs[4:5], vecs[5:6]
    mbias = mbias_ref[...]            # (B*H, 1, S) additive key-mask bias (0 / -1e18)

    inv_d = jnp.float32(1.0 / D)

    def layer_norm(v, g, b):
        # single cross-lane reduce: sum(x) and sum(x*x) in one XLU pass
        m = v.shape[0]
        both = jnp.concatenate([v, v * v], axis=0)        # (2M, D) sublane concat
        sums = jnp.sum(both, axis=-1, keepdims=True)      # (2M, 1)
        mu = sums[:m] * inv_d
        var = sums[m:] * inv_d - mu * mu
        return (v - mu) * jax.lax.rsqrt(var + EPS) * g + b

    # ---- self-attention block (pre-norm), fused QKV projection ----
    xn = layer_norm(x, ln1_g, ln1_b)
    qkv = jnp.dot(xn, qkvw_ref[...], preferred_element_type=jnp.float32) + qkvb_ref[...]
    # 1/sqrt(DH) scale already folded into Wq / bq.

    # Single head-split relayout for the whole slab:
    # (B*S, 3D) -> (B, S, 3H, DH) -> (B, 3H, S, DH); q/k/v are leading-axis slices.
    qkvh = jnp.transpose(qkv.reshape(B, S, 3 * H, DH), (0, 2, 1, 3))
    qh = qkvh[:, 0:H].reshape(B * H, S, DH)
    kh = qkvh[:, H:2 * H].reshape(B * H, S, DH)
    vh = qkvh[:, 2 * H:3 * H].reshape(B * H, S, DH)

    # Batched attention over all batches and heads at once.
    s = jnp.einsum('bqd,bkd->bqk', qh, kh, preferred_element_type=jnp.float32)  # (B*H,S,S)
    s = s + mbias                                    # broadcast over the query axis
    s = s - jnp.max(s, axis=-1, keepdims=True)
    e = jnp.exp(s)
    p = e * _fast_recip(jnp.sum(e, axis=-1, keepdims=True))
    ch = jnp.einsum('bqk,bkd->bqd', p, vh, preferred_element_type=jnp.float32)  # (B*H,S,DH)
    ctx = jnp.transpose(ch.reshape(B, H, S, DH), (0, 2, 1, 3)).reshape(B * S, D)

    attn_out = jnp.dot(ctx, wo_ref[...], preferred_element_type=jnp.float32) + bo
    # TODO(synk): nn.Dropout / attention dropout are identity at inference; no stochastic dropout.
    res1 = attn_out + x

    # ---- PositionwiseFeedForward (its own pre-norm + GELU + residual) ----
    yn = layer_norm(res1, ln2_g, ln2_b)
    hid = jnp.dot(yn, w1_ref[...], preferred_element_type=jnp.float32) + b1_ref[...]
    hid = _gelu_exact(hid)
    ffn = jnp.dot(hid, w2_ref[...], preferred_element_type=jnp.float32) + b2
    # TODO(synk): D=32 output is a masked (32-of-128-lane) store; lane-dense layout
    # would require padding d_model at the model boundary.
    out_ref[...] = ffn + res1


def transformer_encoder_layer(x, mask, params):
    # Pack parameters (done in the wrapper, fused by XLA; the kernel sees 9 inputs).
    scale = jnp.float32(1.0 / np.sqrt(DH))
    qkv_w = jnp.concatenate([params["wq"] * scale, params["wk"], params["wv"]], axis=1)  # (D, 3D)
    qkv_b = jnp.concatenate([params["bq"] * scale, params["bk"], params["bv"]], axis=1)  # (1, 3D)
    vecs = jnp.concatenate([params["ln1_g"], params["ln1_b"],
                            params["ln2_g"], params["ln2_b"],
                            params["bo"], params["b2"]], axis=0)                          # (6, D)
    # Additive key-mask bias, pre-broadcast over heads -> (B*H, 1, S).
    mask_bias = jnp.where(mask != 0, jnp.float32(-1e18), jnp.float32(0.0))                # (B,1,S)
    mbias_bh = jnp.broadcast_to(mask_bias[:, None, :, :], (B, H, 1, S)).reshape(B * H, 1, S)
    x_flat = x.reshape(B * S, D)

    vmem = pl.BlockSpec(memory_space=pltpu.MemorySpace.VMEM)   # whole array resident in VMEM
    out_flat = pl.pallas_call(
        encoder_layer_kernel,
        out_shape=jax.ShapeDtypeStruct((B * S, D), jnp.float32),
        in_specs=[vmem] * 9,
        out_specs=vmem,
    )(x_flat, mbias_bh, qkv_w, qkv_b, params["wo"], vecs,
      params["w1"], params["b1"], params["w2"])
    return out_flat.reshape(B, S, D)


def reference(x, mask, P):
    """Pure-JAX reference replicating the PyTorch forward (eval mode)."""
    def layer_norm(v, g, b):
        mu = v.mean(-1, keepdims=True)
        var = ((v - mu) ** 2).mean(-1, keepdims=True)
        return (v - mu) / jnp.sqrt(var + EPS) * g + b

    xn = layer_norm(x, P["ln1_g"][0], P["ln1_b"][0])
    q = xn @ P["wq"] + P["bq"][0]
    k = xn @ P["wk"] + P["bk"][0]
    v = xn @ P["wv"] + P["bv"][0]
    qh = q.reshape(B, S, H, DH).transpose(0, 2, 1, 3) / np.sqrt(DH)
    kh = k.reshape(B, S, H, DH).transpose(0, 2, 1, 3)
    vh = v.reshape(B, S, H, DH).transpose(0, 2, 1, 3)
    scores = qh @ kh.transpose(0, 1, 3, 2)                      # (B,H,S,S)
    m = (mask[:, :, None, :] != 0)                              # (B,1,1,S)
    scores = jnp.where(m, -1e18, scores)
    p = jax.nn.softmax(scores, axis=-1)
    ctx = (p @ vh).transpose(0, 2, 1, 3).reshape(B, S, D)
    attn_out = ctx @ P["wo"] + P["bo"][0]
    res1 = attn_out + x
    yn = layer_norm(res1, P["ln2_g"][0], P["ln2_b"][0])
    hid = jax.nn.gelu(yn @ P["w1"] + P["b1"][0], approximate=False)
    return hid @ P["w2"] + P["b2"][0] + res1


def init_params(key):
    ks = jax.random.split(key, 12)
    n = lambda k, shape: (0.02 * jax.random.normal(k, shape)).astype(jnp.float32)
    return {
        "ln1_g": jnp.ones((1, D), jnp.float32),
        "ln1_b": jnp.zeros((1, D), jnp.float32),
        "wq": n(ks[0], (D, D)), "bq": n(ks[1], (1, D)),
        "wk": n(ks[2], (D, D)), "bk": n(ks[3], (1, D)),
        "wv": n(ks[4], (D, D)), "bv": n(ks[5], (1, D)),
        "wo": n(ks[6], (D, D)), "bo": n(ks[7], (1, D)),
        "ln2_g": jnp.ones((1, D), jnp.float32),
        "ln2_b": jnp.zeros((1, D), jnp.float32),
        "w1": n(ks[8], (D, DFF)), "b1": n(ks[9], (1, DFF)),
        "w2": n(ks[10], (DFF, D)), "b2": n(ks[11], (1, D)),
    }


if __name__ == "__main__":
    key = jax.random.PRNGKey(0)
    kx, kp = jax.random.split(key)
    x = jax.random.normal(kx, (B, S, D), dtype=jnp.float32)
    # mask: nonzero = padded key position. Batch 0: no padding; batch 1: last 2 padded.
    mask_np = np.zeros((B, 1, S), dtype=np.int32)
    mask_np[1, 0, -2:] = 1
    mask = jnp.asarray(mask_np)

    params = init_params(kp)

    out = jax.jit(transformer_encoder_layer)(x, mask, params)
    out = jax.block_until_ready(out)

    ref = jax.block_until_ready(reference(x, mask, params))
    np.testing.assert_allclose(np.asarray(out), np.asarray(ref), rtol=2e-4, atol=2e-4)

    print("KERNEL_OK")
</pallas_src>

<mosaic_0001>
module attributes {stable_mosaic.version = 11 : i64} {
  func.func @encoder_layer_kernel(%arg0: memref<16x32xf32, #tpu.memory_space<vmem>>, %arg1: memref<8x1x8xf32, #tpu.memory_space<vmem>>, %arg2: memref<32x96xf32, #tpu.memory_space<vmem>>, %arg3: memref<1x96xf32, #tpu.memory_space<vmem>>, %arg4: memref<32x32xf32, #tpu.memory_space<vmem>>, %arg5: memref<6x32xf32, #tpu.memory_space<vmem>>, %arg6: memref<32x64xf32, #tpu.memory_space<vmem>>, %arg7: memref<1x64xf32, #tpu.memory_space<vmem>>, %arg8: memref<64x32xf32, #tpu.memory_space<vmem>>, %arg9: memref<16x32xf32, #tpu.memory_space<vmem>>) attributes {dimension_semantics = [], scalar_prefetch = 0 : i64, scratch_operands = 0 : i64, tpu.core_type = #tpu.core_type<tc>} {
    %c0 = arith.constant 0 : index
    %c0_0 = arith.constant 0 : index
    %0 = vector.load %arg0[%c0, %c0_0] : memref<16x32xf32, #tpu.memory_space<vmem>>, vector<16x32xf32>
    %c0_1 = arith.constant 0 : index
    %c0_2 = arith.constant 0 : index
    %1 = vector.load %arg5[%c0_1, %c0_2] : memref<6x32xf32, #tpu.memory_space<vmem>>, vector<6x32xf32>
    %2 = vector.extract_strided_slice %1 {offsets = [0, 0], sizes = [1, 32], strides = [1, 1]} : vector<6x32xf32> to vector<1x32xf32>
    %3 = vector.extract_strided_slice %1 {offsets = [1, 0], sizes = [1, 32], strides = [1, 1]} : vector<6x32xf32> to vector<1x32xf32>
    %4 = vector.extract_strided_slice %1 {offsets = [2, 0], sizes = [1, 32], strides = [1, 1]} : vector<6x32xf32> to vector<1x32xf32>
    %5 = vector.extract_strided_slice %1 {offsets = [3, 0], sizes = [1, 32], strides = [1, 1]} : vector<6x32xf32> to vector<1x32xf32>
    %6 = vector.extract_strided_slice %1 {offsets = [4, 0], sizes = [1, 32], strides = [1, 1]} : vector<6x32xf32> to vector<1x32xf32>
    %7 = vector.extract_strided_slice %1 {offsets = [5, 0], sizes = [1, 32], strides = [1, 1]} : vector<6x32xf32> to vector<1x32xf32>
    %c0_3 = arith.constant 0 : index
    %c0_4 = arith.constant 0 : index
    %c0_5 = arith.constant 0 : index
    %8 = vector.load %arg1[%c0_3, %c0_4, %c0_5] : memref<8x1x8xf32, #tpu.memory_space<vmem>>, vector<8x1x8xf32>
    %9 = arith.mulf %0, %0 : vector<16x32xf32>
    %10 = tpu.concatenate %0, %9 in 0 : vector<16x32xf32>, vector<16x32xf32> -> vector<32x32xf32>
    %cst = arith.constant dense<0.000000e+00> : vector<32xf32>
    %11 = vector.multi_reduction <add>, %10, %cst [1] : vector<32x32xf32> to vector<32xf32>
    %12 = vector.shape_cast %11 : vector<32xf32> to vector<32x1xf32>
    %13 = vector.extract_strided_slice %12 {offsets = [0, 0], sizes = [16, 1], strides = [1, 1]} : vector<32x1xf32> to vector<16x1xf32>
    %cst_6 = arith.constant 3.125000e-02 : f32
    %14 = vector.broadcast %cst_6 : f32 to vector<16x1xf32>
    %15 = arith.mulf %13, %14 : vector<16x1xf32>
    %16 = vector.extract_strided_slice %12 {offsets = [16, 0], sizes = [16, 1], strides = [1, 1]} : vector<32x1xf32> to vector<16x1xf32>
    %cst_7 = arith.constant 3.125000e-02 : f32
    %17 = vector.broadcast %cst_7 : f32 to vector<16x1xf32>
    %18 = arith.mulf %16, %17 : vector<16x1xf32>
    %19 = arith.mulf %15, %15 : vector<16x1xf32>
    %20 = arith.subf %18, %19 : vector<16x1xf32>
    %21 = vector.broadcast %15 : vector<16x1xf32> to vector<16x32xf32>
    %22 = arith.subf %0, %21 : vector<16x32xf32>
    %cst_8 = arith.constant 9.99999997E-7 : f32
    %23 = vector.broadcast %cst_8 : f32 to vector<16x1xf32>
    %24 = arith.addf %20, %23 : vector<16x1xf32>
    %25 = math.rsqrt %24 : vector<16x1xf32>
    %26 = vector.broadcast %25 : vector<16x1xf32> to vector<16x32xf32>
    %27 = arith.mulf %22, %26 : vector<16x32xf32>
    %28 = vector.broadcast %2 : vector<1x32xf32> to vector<16x32xf32>
    %29 = arith.mulf %27, %28 : vector<16x32xf32>
    %30 = vector.broadcast %3 : vector<1x32xf32> to vector<16x32xf32>
    %31 = arith.addf %29, %30 : vector<16x32xf32>
    %c0_9 = arith.constant 0 : index
    %c0_10 = arith.constant 0 : index
    %32 = vector.load %arg2[%c0_9, %c0_10] : memref<32x96xf32, #tpu.memory_space<vmem>>, vector<32x96xf32>
    %cst_11 = arith.constant dense<0.000000e+00> : vector<16x96xf32>
    %33 = tpu.matmul %31, %32, %cst_11 {dimension_numbers = #tpu.dot_dimension_numbers<[1], [0], [0], [1], [0, 0, 1, 1], [], []>} : vector<16x32xf32>, vector<32x96xf32>, vector<16x96xf32> -> vector<16x96xf32>
    %c0_12 = arith.constant 0 : index
    %c0_13 = arith.constant 0 : index
    %34 = vector.load %arg3[%c0_12, %c0_13] : memref<1x96xf32, #tpu.memory_space<vmem>>, vector<1x96xf32>
    %35 = vector.broadcast %34 : vector<1x96xf32> to vector<16x96xf32>
    %36 = arith.addf %33, %35 : vector<16x96xf32>
    %37 = vector.shape_cast %36 : vector<16x96xf32> to vector<2x8x12x8xf32>
    %38 = tpu.transpose %37, [0, 2, 1, 3] : vector<2x8x12x8xf32> -> vector<2x12x8x8xf32>
    %39 = vector.extract_strided_slice %38 {offsets = [0, 0, 0, 0], sizes = [2, 4, 8, 8], strides = [1, 1, 1, 1]} : vector<2x12x8x8xf32> to vector<2x4x8x8xf32>
    %40 = vector.shape_cast %39 : vector<2x4x8x8xf32> to vector<8x8x8xf32>
    %41 = vector.extract_strided_slice %38 {offsets = [0, 4, 0, 0], sizes = [2, 4, 8, 8], strides = [1, 1, 1, 1]} : vector<2x12x8x8xf32> to vector<2x4x8x8xf32>
    %42 = vector.shape_cast %41 : vector<2x4x8x8xf32> to vector<8x8x8xf32>
    %43 = vector.extract_strided_slice %38 {offsets = [0, 8, 0, 0], sizes = [2, 4, 8, 8], strides = [1, 1, 1, 1]} : vector<2x12x8x8xf32> to vector<2x4x8x8xf32>
    %44 = vector.shape_cast %43 : vector<2x4x8x8xf32> to vector<8x8x8xf32>
    "tpu.trace_start"() <{level = 10 : i32, message = "bqd,bkd->bqk"}> : () -> ()
    %cst_14 = arith.constant dense<0.000000e+00> : vector<8x8x8xf32>
    %45 = tpu.matmul %40, %42, %cst_14 {dimension_numbers = #tpu.dot_dimension_numbers<[2], [2], [1], [1], [0, 0, 0, 1, 1, 1], [0], [0]>} : vector<8x8x8xf32>, vector<8x8x8xf32>, vector<8x8x8xf32> -> vector<8x8x8xf32>
    "tpu.trace_stop"() : () -> ()
    %46 = vector.broadcast %8 : vector<8x1x8xf32> to vector<8x8x8xf32>
    %47 = arith.addf %45, %46 : vector<8x8x8xf32>
    %cst_15 = arith.constant dense<0xFF800000> : vector<8x8xf32>
    %48 = vector.multi_reduction <maximumf>, %47, %cst_15 [2] : vector<8x8x8xf32> to vector<8x8xf32>
    %49 = vector.shape_cast %48 : vector<8x8xf32> to vector<8x8x1xf32>
    %50 = vector.broadcast %49 : vector<8x8x1xf32> to vector<8x8x8xf32>
    %51 = arith.subf %47, %50 : vector<8x8x8xf32>
    %52 = math.exp %51 : vector<8x8x8xf32>
    %cst_16 = arith.constant dense<0.000000e+00> : vector<8x8xf32>
    %53 = vector.multi_reduction <add>, %52, %cst_16 [2] : vector<8x8x8xf32> to vector<8x8xf32>
    %54 = vector.shape_cast %53 : vector<8x8xf32> to vector<8x8x1xf32>
    %55 = tpu.reciprocal %54 {approx = true} : vector<8x8x1xf32> -> vector<8x8x1xf32>
    %56 = arith.mulf %54, %55 : vector<8x8x1xf32>
    %cst_17 = arith.constant 2.000000e+00 : f32
    %57 = vector.broadcast %cst_17 : f32 to vector<8x8x1xf32>
    %58 = arith.subf %57, %56 : vector<8x8x1xf32>
    %59 = arith.mulf %55, %58 : vector<8x8x1xf32>
    %60 = vector.broadcast %59 : vector<8x8x1xf32> to vector<8x8x8xf32>
    %61 = arith.mulf %52, %60 : vector<8x8x8xf32>
    "tpu.trace_start"() <{level = 10 : i32, message = "bqk,bkd->bqd"}> : () -> ()
    %cst_18 = arith.constant dense<0.000000e+00> : vector<8x8x8xf32>
    %62 = tpu.matmul %61, %44, %cst_18 {dimension_numbers = #tpu.dot_dimension_numbers<[2], [1], [1], [2], [0, 0, 0, 1, 1, 2], [0], [0]>} : vector<8x8x8xf32>, vector<8x8x8xf32>, vector<8x8x8xf32> -> vector<8x8x8xf32>
    "tpu.trace_stop"() : () -> ()
    %63 = vector.shape_cast %62 : vector<8x8x8xf32> to vector<2x4x8x8xf32>
    %64 = tpu.transpose %63, [0, 2, 1, 3] : vector<2x4x8x8xf32> -> vector<2x8x4x8xf32>
    %65 = vector.shape_cast %64 : vector<2x8x4x8xf32> to vector<16x32xf32>
    %c0_19 = arith.constant 0 : index
    %c0_20 = arith.constant 0 : index
    %66 = vector.load %arg4[%c0_19, %c0_20] : memref<32x32xf32, #tpu.memory_space<vmem>>, vector<32x32xf32>
    %cst_21 = arith.constant dense<0.000000e+00> : vector<16x32xf32>
    %67 = tpu.matmul %65, %66, %cst_21 {dimension_numbers = #tpu.dot_dimension_numbers<[1], [0], [0], [1], [0, 0, 1, 1], [], []>} : vector<16x32xf32>, vector<32x32xf32>, vector<16x32xf32> -> vector<16x32xf32>
    %68 = vector.broadcast %6 : vector<1x32xf32> to vector<16x32xf32>
    %69 = arith.addf %67, %68 : vector<16x32xf32>
    %70 = arith.addf %69, %0 : vector<16x32xf32>
    %71 = arith.mulf %70, %70 : vector<16x32xf32>
    %72 = tpu.concatenate %70, %71 in 0 : vector<16x32xf32>, vector<16x32xf32> -> vector<32x32xf32>
    %cst_22 = arith.constant dense<0.000000e+00> : vector<32xf32>
    %73 = vector.multi_reduction <add>, %72, %cst_22 [1] : vector<32x32xf32> to vector<32xf32>
    %74 = vector.shape_cast %73 : vector<32xf32> to vector<32x1xf32>
    %75 = vector.extract_strided_slice %74 {offsets = [0, 0], sizes = [16, 1], strides = [1, 1]} : vector<32x1xf32> to vector<16x1xf32>
    %cst_23 = arith.constant 3.125000e-02 : f32
    %76 = vector.broadcast %cst_23 : f32 to vector<16x1xf32>
    %77 = arith.mulf %75, %76 : vector<16x1xf32>
    %78 = vector.extract_strided_slice %74 {offsets = [16, 0], sizes = [16, 1], strides = [1, 1]} : vector<32x1xf32> to vector<16x1xf32>
    %cst_24 = arith.constant 3.125000e-02 : f32
    %79 = vector.broadcast %cst_24 : f32 to vector<16x1xf32>
    %80 = arith.mulf %78, %79 : vector<16x1xf32>
    %81 = arith.mulf %77, %77 : vector<16x1xf32>
    %82 = arith.subf %80, %81 : vector<16x1xf32>
    %83 = vector.broadcast %77 : vector<16x1xf32> to vector<16x32xf32>
    %84 = arith.subf %70, %83 : vector<16x32xf32>
    %cst_25 = arith.constant 9.99999997E-7 : f32
    %85 = vector.broadcast %cst_25 : f32 to vector<16x1xf32>
    %86 = arith.addf %82, %85 : vector<16x1xf32>
    %87 = math.rsqrt %86 : vector<16x1xf32>
    %88 = vector.broadcast %87 : vector<16x1xf32> to vector<16x32xf32>
    %89 = arith.mulf %84, %88 : vector<16x32xf32>
    %90 = vector.broadcast %4 : vector<1x32xf32> to vector<16x32xf32>
    %91 = arith.mulf %89, %90 : vector<16x32xf32>
    %92 = vector.broadcast %5 : vector<1x32xf32> to vector<16x32xf32>
    %93 = arith.addf %91, %92 : vector<16x32xf32>
    %c0_26 = arith.constant 0 : index
    %c0_27 = arith.constant 0 : index
    %94 = vector.load %arg6[%c0_26, %c0_27] : memref<32x64xf32, #tpu.memory_space<vmem>>, vector<32x64xf32>
    %cst_28 = arith.constant dense<0.000000e+00> : vector<16x64xf32>
    %95 = tpu.matmul %93, %94, %cst_28 {dimension_numbers = #tpu.dot_dimension_numbers<[1], [0], [0], [1], [0, 0, 1, 1], [], []>} : vector<16x32xf32>, vector<32x64xf32>, vector<16x64xf32> -> vector<16x64xf32>
    %c0_29 = arith.constant 0 : index
    %c0_30 = arith.constant 0 : index
    %96 = vector.load %arg7[%c0_29, %c0_30] : memref<1x64xf32, #tpu.memory_space<vmem>>, vector<1x64xf32>
    %97 = vector.broadcast %96 : vector<1x64xf32> to vector<16x64xf32>
    %98 = arith.addf %95, %97 : vector<16x64xf32>
    %cst_31 = arith.constant 5.000000e-01 : f32
    %99 = vector.broadcast %cst_31 : f32 to vector<16x64xf32>
    %100 = arith.mulf %99, %98 : vector<16x64xf32>
    %cst_32 = arith.constant 0.707106769 : f32
    %101 = vector.broadcast %cst_32 : f32 to vector<16x64xf32>
    %102 = arith.mulf %98, %101 : vector<16x64xf32>
    %cst_33 = arith.constant 0.000000e+00 : f32
    %103 = vector.broadcast %cst_33 : f32 to vector<16x64xf32>
    %104 = arith.cmpf olt, %102, %103 : vector<16x64xf32>
    %cst_34 = arith.constant -1.000000e+00 : f32
    %cst_35 = arith.constant 1.000000e+00 : f32
    %105 = vector.broadcast %cst_34 : f32 to vector<16x64xf32>
    %106 = vector.broadcast %cst_35 : f32 to vector<16x64xf32>
    %107 = arith.select %104, %105, %106 : vector<16x64xi1>, vector<16x64xf32>
    %108 = math.absf %102 : vector<16x64xf32>
    %cst_36 = arith.constant 0.327591091 : f32
    %109 = vector.broadcast %cst_36 : f32 to vector<16x64xf32>
    %110 = arith.mulf %109, %108 : vector<16x64xf32>
    %cst_37 = arith.constant 1.000000e+00 : f32
    %111 = vector.broadcast %cst_37 : f32 to vector<16x64xf32>
    %112 = arith.addf %111, %110 : vector<16x64xf32>
    %113 = tpu.reciprocal %112 {approx = true} : vector<16x64xf32> -> vector<16x64xf32>
    %114 = arith.mulf %112, %113 : vector<16x64xf32>
    %cst_38 = arith.constant 2.000000e+00 : f32
    %115 = vector.broadcast %cst_38 : f32 to vector<16x64xf32>
    %116 = arith.subf %115, %114 : vector<16x64xf32>
    %117 = arith.mulf %113, %116 : vector<16x64xf32>
    %cst_39 = arith.constant 1.06140542 : f32
    %118 = vector.broadcast %cst_39 : f32 to vector<16x64xf32>
    %119 = arith.mulf %118, %117 : vector<16x64xf32>
    %cst_40 = arith.constant -1.45315206 : f32
    %120 = vector.broadcast %cst_40 : f32 to vector<16x64xf32>
    %121 = arith.addf %119, %120 : vector<16x64xf32>
    %122 = arith.mulf %121, %117 : vector<16x64xf32>
    %cst_41 = arith.constant 1.42141378 : f32
    %123 = vector.broadcast %cst_41 : f32 to vector<16x64xf32>
    %124 = arith.addf %122, %123 : vector<16x64xf32>
    %125 = arith.mulf %124, %117 : vector<16x64xf32>
    %cst_42 = arith.constant -0.284496725 : f32
    %126 = vector.broadcast %cst_42 : f32 to vector<16x64xf32>
    %127 = arith.addf %125, %126 : vector<16x64xf32>
    %128 = arith.mulf %127, %117 : vector<16x64xf32>
    %cst_43 = arith.constant 0.254829586 : f32
    %129 = vector.broadcast %cst_43 : f32 to vector<16x64xf32>
    %130 = arith.addf %128, %129 : vector<16x64xf32>
    %131 = arith.mulf %130, %117 : vector<16x64xf32>
    %cst_44 = arith.constant 0.000000e+00 : f32
    %132 = vector.broadcast %cst_44 : f32 to vector<16x64xf32>
    %133 = arith.subf %132, %108 : vector<16x64xf32>
    %134 = arith.mulf %133, %108 : vector<16x64xf32>
    %135 = math.exp %134 : vector<16x64xf32>
    %136 = arith.mulf %131, %135 : vector<16x64xf32>
    %cst_45 = arith.constant 1.000000e+00 : f32
    %137 = vector.broadcast %cst_45 : f32 to vector<16x64xf32>
    %138 = arith.subf %137, %136 : vector<16x64xf32>
    %139 = arith.mulf %107, %138 : vector<16x64xf32>
    %cst_46 = arith.constant 1.000000e+00 : f32
    %140 = vector.broadcast %cst_46 : f32 to vector<16x64xf32>
    %141 = arith.addf %140, %139 : vector<16x64xf32>
    %142 = arith.mulf %100, %141 : vector<16x64xf32>
    %c0_47 = arith.constant 0 : index
    %c0_48 = arith.constant 0 : index
    %143 = vector.load %arg8[%c0_47, %c0_48] : memref<64x32xf32, #tpu.memory_space<vmem>>, vector<64x32xf32>
    %cst_49 = arith.constant dense<0.000000e+00> : vector<16x32xf32>
    %144 = tpu.matmul %142, %143, %cst_49 {dimension_numbers = #tpu.dot_dimension_numbers<[1], [0], [0], [1], [0, 0, 1, 1], [], []>} : vector<16x64xf32>, vector<64x32xf32>, vector<16x32xf32> -> vector<16x32xf32>
    %145 = vector.broadcast %7 : vector<1x32xf32> to vector<16x32xf32>
    %146 = arith.addf %144, %145 : vector<16x32xf32>
    %147 = arith.addf %146, %70 : vector<16x32xf32>
    %c0_50 = arith.constant 0 : index
    %c0_51 = arith.constant 0 : index
    %148 = vector.load %arg9[%c0_50, %c0_51] : memref<16x32xf32, #tpu.memory_space<vmem>>, vector<16x32xf32>
    tpu.vector_store %arg9[%c0_50, %c0_51], %147 {strides = array<i32>} : memref<16x32xf32, #tpu.memory_space<vmem>>, vector<16x32xf32>,
    return
  }
}

</mosaic_0001>

<bundles_post_ra>
// kernel: transformer_encoder_layer.1
= control target key start
LH: loop header
LB: loop body
LE: loop exit
PB: predicated region body
PF: predicated region fallthrough
CT: control target
= control target key end

     0   :  { %vm46_vm0 = vcmask 261120   ;;  %s4055_s0 = inlined_call_operand.vmem [shape: f32[16,32], index: 0, kind: input, shape index: {}]   ;;  %s4056_s1 = inlined_call_operand.vmem [shape: f32[8,1,8], index: 1, kind: input, shape index: {}]   ;;  %s4057_s2 = inlined_call_operand.vmem [shape: f32[32,96], index: 2, kind: input, shape index: {}]   ;;  %s4058_s3 = inlined_call_operand.vmem [shape: f32[1,96], index: 3, kind: input, shape index: {}]   ;;  %s4059_s4 = inlined_call_operand.vmem [shape: f32[32,32], index: 4, kind: input, shape index: {}]   ;;  %s4060_s5 = inlined_call_operand.vmem [shape: f32[6,32], index: 5, kind: input, shape index: {}]   ;;  %s4061_s6 = inlined_call_operand.vmem [shape: f32[32,64], index: 6, kind: input, shape index: {}]   ;;  %s4062_s7 = inlined_call_operand.vmem [shape: f32[1,64], index: 7, kind: input, shape index: {}]   ;;  %s4063_s8 = inlined_call_operand.vmem [shape: f32[64,32], index: 8, kind: input, shape index: {}]   ;;  %s4064_s9 = inlined_call_operand.hbm [shape: f32[16,32], index: 9, kind: output, shape index: {}]  }
   0x1   :  { %v33_v0 = vld [vmem:[%s4055_s0] sm:$0xff]  ;;  %v34_v1 = vld [vmem:[%s4055_s0 + $0x8] sm:$0xff] }
   0x2   :  { %14 = vsyncpa [#allocation3], 0  ;;  %v47_v2 = vsel %vm46_vm0, %v33_v0, 0.0  ;;  %v44_v3 = vmul.f32 %v33_v0, %v33_v0  ;;  %v45_v4 = vmul.f32 %v34_v1, %v34_v1  ;;  %v50_v6 = vsel %vm46_vm0, %v34_v1, 0.0  ;;  %v90_v8 = vld [vmem:[%s4057_s2 + $0x18] sm:$0xff]  ;;  %v89_v9 = vld [vmem:[%s4057_s2 + $0x10] sm:$0xff] }
   0x3   :  { %48 = vadd.xlane.f32.xlu0 %v47_v2  ;;  %3243 = vmatprep.subr.mxu1 %v90_v8  ;;  %v88_v10 = vld [vmem:[%s4057_s2 + $0x8] sm:$0xff]  ;;  %v87_v11 = vld [vmem:[%s4057_s2] sm:$0xff]  ;;  %v75_v25 = vlaneseq  ;;  %s3469_s24 = smov 96   ;;  %s3470_s25 = smov 88   ;;  %v3476_v48 = vmov 0.0   ;;  %vm3477_vm1 = vmmov 0  }
   0x4   :  { %v53_v5 = vsel %vm46_vm0, %v44_v3, 0.0  ;;  %v56_v7 = vsel %vm46_vm0, %v45_v4, 0.0  ;;  %3244 = vmatpush3.msra.mxu1 %v90_v8  ;;  %v35_v29 = vld [vmem:[%s4060_s5] sm:$0x3f]  ;;  %s3471_s26 = smov 120   ;;  %s3472_s27 = smov 80   ;;  %3264 = vmatprep.subr.mxu0 %v3476_v48 }
   0x5   :  { %54 = vadd.xlane.f32.xlu1 %v53_v5  ;;  %3245 = vmatprep.subr.mxu1 %v89_v9  ;;  %v3562_v27 = vshrl.u32 %v75_v25, 7  ;;  %v3117_v43 = vld [vmem:[%s4058_s3] ss:$0 sm:$0xff]  ;;  %s3473_s3 = smov 104   ;;  %s3474_s28 = smov 72   ;;  %vm1111_vm2 = vcmask 64512  }
   0x6   :  { %3246 = vmatpush3.msra.mxu1 %v89_v9  ;;  %s3475_s29 = smov 112   ;;  %3266 = vmatprep.mubr.msk.f32.mxu0 %vm3477_vm1, %v3476_v48  ;;  %v3478_v51 = vmov 1983009808   ;;  %v3479_v54 = vmov 1934713408   ;;  %s3480_s2 = smov 56  }
   0x7   :  { %51 = vadd.xlane.f32.xlu0 %v50_v6  ;;  %3247 = vmatprep.subr.mxu1 %v88_v10  ;;  %v77_v28 = vsub.s32 0, %v3562_v27  ;;  %v83_v30 = vsub.s32 1, %v3562_v27  ;;  %v250_v52 = vunpack.c.l.s4 %v3478_v51  ;;  %v314_v55 = vunpack.c.l.s4 %v3479_v54  ;;  %s3481_s21 = smov 48   ;;  %s3482_s22 = smov 40  }
   0x8   :  { %3248 = vmatpush3.msra.mxu1 %v88_v10  ;;  %s3483_s23 = smov 64   ;;  %vm2714_vm3 = vcmask 130048   ;;  %vm2717_vm4 = vcmask 195584   ;;  %vm3015_vm7 = vcmask 523264  }
   0x9   :  { %57 = vadd.xlane.f32.xlu1 %v56_v7  ;;  %3249 = vmatprep.subr.mxu1 %v87_v11  ;;  %v78_v32 = vrot.slane %v35_v29, %v77_v28  ;;  %v84_v35 = vrot.slane %v35_v29, %v83_v30  ;;  %v251_v57 = vunpack.c.0.s8 %v250_v52  ;;  %v315_v59 = vunpack.c.0.s8 %v314_v55 }
   0xa   :  { %3250 = vmatpush3.msra.mxu1 %v87_v11 }
   0xb   :  { %3254 = vmatprep.subr.mxu1 %v3476_v48  ;;  %v3601_v61 = vsub.s32 %v251_v57, %v3562_v27  ;;  %v3604_v3 = vsub.s32 %v315_v59, %v3562_v27 }
  0x8c   :  { %v49_v12 = vpop.xlane.xlu0 %48 }
  0x8d   :  { %v59_v13 = vmul.f32 0.03125, %v49_v12 }
  0x8e   :  { %v55_v14 = vpop.xlane.xlu1 %54 }
  0x8f   :  { %v63_v15 = vmul.f32 %v59_v13, %v59_v13  ;;  %v61_v16 = vmul.f32 0.03125, %v55_v14  ;;  %v67_v31 = vsub.f32 %v33_v0, %v59_v13 }
  0x90   :  { %v52_v17 = vpop.xlane.xlu0 %51 }
  0x91   :  { %v65_v18 = vsub.f32 %v61_v16, %v63_v15  ;;  %v60_v19 = vmul.f32 0.03125, %v52_v17 }
  0x92   :  { %v58_v20 = vpop.xlane.xlu1 %57 }
  0x93   :  { %v69_v21 = vadd.f32 1e-06, %v65_v18  ;;  %v64_v22 = vmul.f32 %v60_v19, %v60_v19  ;;  %v62_v23 = vmul.f32 0.03125, %v58_v20  ;;  %v68_v36 = vsub.f32 %v34_v1, %v60_v19 }
  0x95   :  { %3396 = vrsqrt.f32 %v69_v21  ;;  %v66_v24 = vsub.f32 %v62_v23, %v64_v22 }
  0x97   :  { %v70_v26 = vadd.f32 1e-06, %v66_v24 }
  0x99   :  { %3398 = vrsqrt.f32 %v70_v26 }
  0xa2   :  { %v3397_v33 = vpop.eup %3396 }
  0xa3   :  { %v73_v34 = vmul.f32 %v3397_v33, %v67_v31 }
  0xa5   :  { %v79_v37 = vmul.f32 %v78_v32, %v73_v34 }
  0xa6   :  { %v3399_v38 = vpop.eup %3398 }
  0xa7   :  { %v74_v39 = vmul.f32 %v3399_v38, %v68_v36  ;;  %v85_v40 = vadd.f32 %v84_v35, %v79_v37 }
  0xa9   :  { %v80_v41 = vmul.f32 %v78_v32, %v74_v39  ;;  %3251 = vmatprep.mubr.msk.f32.mxu1 %vm46_vm0, %v85_v40 }
  0xab   :  { %v86_v42 = vadd.f32 %v84_v35, %v80_v41 }
  0xad   :  { %3252 = vmatmul.mubr.msk.f32.vlgmr.msra.gmra.mxu1 %vm46_vm0, %v86_v42 }
  0xae   :  { %3256 = vmatprep.mubr.msk.f32.mxu1 %vm3477_vm1, %v3476_v48 }
 0x16d   :  { %v3253_v44 = vpop.f32.mrf.mxu1 }
 0x16e   :  { %v3574_v45 = vadd.f32 %v3253_v44, %v3117_v43 }
 0x16f   :  { %v170_v46 = vpop.f32.mrf.mxu1 }
 0x170   :  { %v3576_v47 = vadd.f32 %v3117_v43, %v170_v46  ;;  %201 = vrot.lane.b32.xlu1 %v3574_v45, %s3469_s24 }
 0x172   :  { %199 = vrot.lane.b32.xlu0 %v3576_v47, %s3469_s24 }
 0x174   :  { %205 = vrot.lane.b32.xlu1 %v3576_v47, %s3470_s25 }
 0x176   :  { %181 = vrot.lane.b32.xlu0 %v3576_v47, %s3471_s26 }
 0x178   :  { %211 = vrot.lane.b32.xlu1 %v3576_v47, %s3472_s27 }
 0x17a   :  { %193 = vrot.lane.b32.xlu0 %v3576_v47, %s3473_s3 }
 0x17c   :  { %217 = vrot.lane.b32.xlu1 %v3576_v47, %s3474_s28 }
 0x17e   :  { %207 = vrot.lane.b32.xlu0 %v3574_v45, %s3470_s25 }
 0x180   :  { %187 = vrot.lane.b32.xlu1 %v3576_v47, %s3475_s29 }
 0x182   :  { %219 = vrot.lane.b32.xlu0 %v3574_v45, %s3474_s28  ;;  %s3486_s28 = smov 24  }
 0x184   :  { %213 = vrot.lane.b32.xlu1 %v3574_v45, %s3472_s27 }
 0x186   :  { %189 = vrot.lane.b32.xlu0 %v3574_v45, %s3475_s29 }
 0x188   :  { %183 = vrot.lane.b32.xlu1 %v3574_v45, %s3471_s26 }
 0x18c   :  { %195 = vrot.lane.b32.xlu1 %v3574_v45, %s3473_s3  ;;  %s3485_s3 = smov 16  }
 0x1e2   :  { %v3598_v49 = vpop.permute.xlu1 %201 }
 0x1e4   :  { %v200_v50 = vpop.permute.xlu0 %199 }
 0x1e6   :  { %v206_v53 = vpop.permute.xlu1 %205 }
 0x1e8   :  { %v182_v56 = vpop.permute.xlu0 %181 }
 0x1ea   :  { %v212_v58 = vpop.permute.xlu1 %211 }
 0x1eb   :  { %v279_v62 = vcombine.low %v200_v50, %v212_v58  ;;  %v280_v63 = vcombine.high %v200_v50, %v212_v58 }
 0x1ec   :  { %v194_v60 = vpop.permute.xlu0 %193 }
 0x1ed   :  { %v263_v4 = vcombine.low %v182_v56, %v194_v60  ;;  %v264_v5 = vcombine.high %v182_v56, %v194_v60  ;;  %v287_v7 = vrot.slane %v279_v62, %v3601_v61  ;;  %v294_v8 = vrot.slane %v280_v63, %v3601_v61 }
 0x1ee   :  { %v218_v0 = vpop.permute.xlu1 %217 }
 0x1ef   :  { %v295_v1 = vcombine.low %v206_v53, %v218_v0  ;;  %v296_v2 = vcombine.high %v206_v53, %v218_v0  ;;  %v271_v16 = vrot.slane %v263_v4, %v3601_v61  ;;  %v278_v17 = vrot.slane %v264_v5, %v3601_v61 }
 0x1f0   :  { %v208_v6 = vpop.permute.xlu0 %207 }
 0x1f1   :  { %v303_v9 = vrot.slane %v295_v1, %v3601_v61  ;;  %v310_v10 = vrot.slane %v296_v2, %v3601_v61 }
 0x1f2   :  { %v188_v11 = vpop.permute.xlu1 %187 }
 0x1f3   :  { %v343_v12 = vcombine.low %v287_v7, %v303_v9  ;;  %v344_v13 = vcombine.high %v287_v7, %v303_v9  ;;  %v359_v14 = vcombine.low %v294_v8, %v310_v10  ;;  %v360_v15 = vcombine.high %v294_v8, %v310_v10 }
 0x1f4   :  { %v247_v18 = vcombine.low %v3576_v47, %v188_v11  ;;  %v248_v19 = vcombine.high %v3576_v47, %v188_v11  ;;  %v220_v20 = vpop.permute.xlu0 %219 }
 0x1f5   :  { %v351_v21 = vrot.slane %v343_v12, %v3604_v3  ;;  %v358_v22 = vrot.slane %v344_v13, %v3604_v3  ;;  %v367_v23 = vrot.slane %v359_v14, %v3604_v3  ;;  %v374_v24 = vrot.slane %v360_v15, %v3604_v3 }
 0x1f6   :  { %v255_v25 = vrot.slane %v247_v18, %v3601_v61  ;;  %v262_v26 = vrot.slane %v248_v19, %v3601_v61  ;;  %v499_v28 = vcombine.low %v208_v6, %v220_v20  ;;  %v500_v29 = vcombine.high %v208_v6, %v220_v20  ;;  %v214_v30 = vpop.permute.xlu1 %213 }
 0x1f7   :  { %v3121_v31 = vcombine.low %v351_v21, %v358_v22  ;;  %v3123_v32 = vcombine.high %v351_v21, %v358_v22  ;;  %v3125_v33 = vcombine.low %v367_v23, %v374_v24  ;;  %v3127_v34 = vcombine.high %v367_v23, %v374_v24 }
 0x1f8   :  { %v311_v35 = vcombine.low %v255_v25, %v271_v16  ;;  %v312_v36 = vcombine.high %v255_v25, %v271_v16  ;;  %v327_v37 = vcombine.low %v262_v26, %v278_v17  ;;  %v328_v38 = vcombine.high %v262_v26, %v278_v17  ;;  %v190_v51 = vpop.permute.xlu0 %189 }
 0x1f9   :  { %v3621_v39 = vrot.slane %v3121_v31, %v3601_v61  ;;  %v3624_v40 = vrot.slane %v3123_v32, %v3601_v61  ;;  %v3627_v41 = vrot.slane %v3125_v33, %v3601_v61  ;;  %v3630_v42 = vrot.slane %v3127_v34, %v3601_v61 }
 0x1fa   :  { %v319_v43 = vrot.slane %v311_v35, %v3604_v3  ;;  %v326_v44 = vrot.slane %v312_v36, %v3604_v3  ;;  %v335_v46 = vrot.slane %v327_v37, %v3604_v3  ;;  %v342_v50 = vrot.slane %v328_v38, %v3604_v3  ;;  %v184_v52 = vpop.permute.xlu1 %183 }
 0x1fb   :  { %v735_v53 = vcombine.low %v3621_v39, %v3624_v40  ;;  %v767_v54 = vcombine.low %v3627_v41, %v3630_v42  ;;  %v507_v55 = vrot.slane %v499_v28, %v3601_v61  ;;  %v483_v60 = vcombine.low %v3598_v49, %v214_v30 }
 0x1fc   :  { %v3120_v56 = vcombine.low %v319_v43, %v326_v44  ;;  %v3122_v57 = vcombine.high %v319_v43, %v326_v44  ;;  %v3124_v58 = vcombine.low %v335_v46, %v342_v50  ;;  %v3126_v59 = vcombine.high %v335_v46, %v342_v50 }
 0x1fd   :  { %v484_v62 = vcombine.high %v3598_v49, %v214_v30  ;;  %v451_v63 = vcombine.low %v3574_v45, %v190_v51  ;;  %v452_v0 = vcombine.high %v3574_v45, %v190_v51  ;;  %v514_v5 = vrot.slane %v500_v29, %v3601_v61 }
 0x1fe   :  { %v3646_v1 = vrot.slane %v3120_v56, %v3601_v61  ;;  %v3649_v2 = vrot.slane %v3122_v57, %v3601_v61  ;;  %v3652_v4 = vrot.slane %v3124_v58, %v3601_v61  ;;  %v196_v6 = vpop.permute.xlu1 %195  ;;  %v3656_v7 = vrot.slane %v3126_v59, %v3601_v61 }
 0x1ff   :  { %v491_v49 = vrot.slane %v483_v60, %v3601_v61  ;;  %v498_v8 = vrot.slane %v484_v62, %v3601_v61  ;;  %v459_v9 = vrot.slane %v451_v63, %v3601_v61  ;;  %v466_v11 = vrot.slane %v452_v0, %v3601_v61 }
 0x200   :  { %v719_v10 = vcombine.low %v3646_v1, %v3649_v2  ;;  %v467_v12 = vcombine.low %v184_v52, %v196_v6  ;;  %v468_v13 = vcombine.high %v184_v52, %v196_v6  ;;  %v3667_v20 = vrot.slane %v735_v53, %v3604_v3 }
 0x201   :  { %v547_v14 = vcombine.low %v491_v49, %v507_v55  ;;  %v548_v15 = vcombine.high %v491_v49, %v507_v55  ;;  %v563_v16 = vcombine.low %v498_v8, %v514_v5  ;;  %v564_v17 = vcombine.high %v498_v8, %v514_v5 }
 0x202   :  { %v475_v18 = vrot.slane %v467_v12, %v3601_v61  ;;  %v482_v19 = vrot.slane %v468_v13, %v3601_v61  ;;  %v3670_v21 = vrot.slane %v767_v54, %v3604_v3  ;;  %v751_v55 = vcombine.low %v3652_v4, %v3656_v7 }
 0x203   :  { %v555_v22 = vrot.slane %v547_v14, %v3604_v3  ;;  %v562_v23 = vrot.slane %v548_v15, %v3604_v3  ;;  %v571_v24 = vrot.slane %v563_v16, %v3604_v3  ;;  %v578_v25 = vrot.slane %v564_v17, %v3604_v3 }
 0x204   :  { %v515_v26 = vcombine.low %v459_v9, %v475_v18  ;;  %v516_v28 = vcombine.high %v459_v9, %v475_v18  ;;  %v531_v29 = vcombine.low %v466_v11, %v482_v19  ;;  %v532_v30 = vcombine.high %v466_v11, %v482_v19 }
 0x205   :  { %v3131_v31 = vcombine.low %v555_v22, %v562_v23  ;;  %v3133_v32 = vcombine.high %v555_v22, %v562_v23  ;;  %v3135_v33 = vcombine.low %v571_v24, %v578_v25  ;;  %v3137_v34 = vcombine.high %v571_v24, %v578_v25 }
 0x206   :  { %v523_v35 = vrot.slane %v515_v26, %v3604_v3  ;;  %v530_v36 = vrot.slane %v516_v28, %v3604_v3  ;;  %v539_v37 = vrot.slane %v531_v29, %v3604_v3  ;;  %v546_v38 = vrot.slane %v532_v30, %v3604_v3 }
 0x207   :  { %v874_v43 = vrot.slane %v3131_v31, %v3601_v61  ;;  %v890_v44 = vrot.slane %v3133_v32, %v3601_v61  ;;  %v906_v46 = vrot.slane %v3135_v33, %v3601_v61  ;;  %v922_v50 = vrot.slane %v3137_v34, %v3601_v61 }
 0x208   :  { %v3130_v51 = vcombine.low %v523_v35, %v530_v36  ;;  %v3132_v52 = vcombine.high %v523_v35, %v530_v36  ;;  %v3134_v53 = vcombine.low %v539_v37, %v546_v38  ;;  %v3136_v54 = vcombine.high %v539_v37, %v546_v38  ;;  %v3140_v36 = vld [vmem:[%s4056_s1] ss:$0 sm:$0xff] }
 0x209   :  { %v939_v56 = vcombine.low %v874_v43, %v890_v44  ;;  %v971_v57 = vcombine.low %v906_v46, %v922_v50  ;;  %v787_v63 = vcombine.low %v3667_v20, %v3670_v21  ;;  %v736_v0 = vcombine.high %v3621_v39, %v3624_v40 }
 0x20a   :  { %v867_v58 = vrot.slane %v3130_v51, %v3601_v61  ;;  %v883_v59 = vrot.slane %v3132_v52, %v3601_v61  ;;  %v899_v60 = vrot.slane %v3134_v53, %v3601_v61  ;;  %v915_v62 = vrot.slane %v3136_v54, %v3601_v61 }
 0x20b   :  { %v768_v5 = vcombine.high %v3627_v41, %v3630_v42  ;;  %v727_v6 = vrot.slane %v719_v10, %v3604_v3  ;;  %3255 = vmatpush3.xpose.msk.msra.mxu1 %vm1111_vm2, %v787_v63  ;;  %v750_v9 = vrot.slane %v736_v0, %v3604_v3  ;;  %v759_v12 = vrot.slane %v751_v55, %v3604_v3 }
 0x20c   :  { %v923_v49 = vcombine.low %v867_v58, %v883_v59  ;;  %v955_v8 = vcombine.low %v899_v60, %v915_v62  ;;  %3259 = vmatprep.subr.mxu1 %v3476_v48  ;;  %v720_v39 = vcombine.high %v3646_v1, %v3649_v2  ;;  %v752_v40 = vcombine.high %v3652_v4, %v3656_v7 }
 0x20d   :  { %v782_v11 = vrot.slane %v768_v5, %v3604_v3  ;;  %v947_v41 = vrot.slane %v939_v56, %v3604_v3  ;;  %v979_v42 = vrot.slane %v971_v57, %v3604_v3  ;;  %v940_v10 = vcombine.high %v874_v43, %v890_v44  ;;  %v3142_v43 = vld [vmem:[%s4056_s1 + $0x2] ss:$0 sm:$0xff]  ;;  %v3143_v57 = vld [vmem:[%s4056_s1 + $0x3] ss:$0 sm:$0xff] }
 0x20e   :  { %v972_v13 = vcombine.high %v906_v46, %v922_v50  ;;  %v783_v15 = vcombine.low %v727_v6, %v759_v12  ;;  %v788_v16 = vcombine.high %v3667_v20, %v3670_v21  ;;  %v734_v17 = vrot.slane %v720_v39, %v3604_v3  ;;  %v3141_v46 = vld [vmem:[%s4056_s1 + $0x1] ss:$0 sm:$0xff] }
 0x20f   :  { %v789_v14 = vcombine.low %v750_v9, %v782_v11  ;;  %v766_v18 = vrot.slane %v752_v40, %v3604_v3  ;;  %v991_v1 = vcombine.low %v947_v41, %v979_v42  ;;  %v931_v2 = vrot.slane %v923_v49, %v3604_v3 }
 0x210   :  { %3257 = vmatmul.mubr.msk.f32.vlgmr.msra.gmra.mxu1 %vm1111_vm2, %v783_v15  ;;  %v963_v4 = vrot.slane %v955_v8, %v3604_v3  ;;  %v924_v7 = vcombine.high %v867_v58, %v883_v59  ;;  %v956_v19 = vcombine.high %v899_v60, %v915_v62  ;;  %v784_v20 = vcombine.high %v727_v6, %v759_v12  ;;  %v3144_v58 = vld [vmem:[%s4056_s1 + $0x4] ss:$0 sm:$0xff]  ;;  %v3146_v8 = vld [vmem:[%s4056_s1 + $0x6] ss:$0 sm:$0xff]  ;;  %v3145_v15 = vld [vmem:[%s4056_s1 + $0x5] ss:$0 sm:$0xff] }
 0x211   :  { %3265 = vmatpush3.xpose.msk.msra.mxu0 %vm1111_vm2, %v789_v14  ;;  %3260 = vmatpush3.xpose.msk.msra.mxu1 %vm1111_vm2, %v788_v16  ;;  %v785_v22 = vcombine.low %v734_v17, %v766_v18  ;;  %v954_v21 = vrot.slane %v940_v10, %v3604_v3  ;;  %v986_v23 = vrot.slane %v972_v13, %v3604_v3 }
 0x212   :  { %3261 = vmatprep.mubr.msk.f32.mxu1 %vm3477_vm1, %v3476_v48  ;;  %3269 = vmatprep.subr.mxu1 %v3476_v48  ;;  %v790_v24 = vcombine.high %v750_v9, %v782_v11  ;;  %v987_v25 = vcombine.low %v931_v2, %v963_v4  ;;  %v938_v26 = vrot.slane %v924_v7, %v3604_v3 }
 0x213   :  { %3274 = vmatprep.subr.mxu0 %v3476_v48  ;;  %v970_v28 = vrot.slane %v956_v19, %v3604_v3  ;;  %v786_v29 = vcombine.high %v734_v17, %v766_v18  ;;  %v993_v30 = vcombine.low %v954_v21, %v986_v23  ;;  %v992_v31 = vcombine.high %v947_v41, %v979_v42  ;;  %v3147_v17 = vld [vmem:[%s4056_s1 + $0x7] ss:$0 sm:$0xff]  ;;  %s3484_s1 = smov 8  }
 0x214   :  { %3267 = vmatmul.mubr.msk.f32.vlgmr.msra.gmra.mxu0 %vm1111_vm2, %v785_v22  ;;  %3262 = vmatmul.mubr.msk.f32.vlgmr.msra.gmra.mxu1 %vm1111_vm2, %v784_v20  ;;  %v988_v32 = vcombine.high %v931_v2, %v963_v4  ;;  %v994_v34 = vcombine.high %v954_v21, %v986_v23 }
 0x215   :  { %3275 = vmatpush3.xpose.msk.msra.mxu0 %vm1111_vm2, %v991_v1  ;;  %3270 = vmatpush3.xpose.msk.msra.mxu1 %vm1111_vm2, %v790_v24  ;;  %v989_v33 = vcombine.low %v938_v26, %v970_v28  ;;  %v990_v35 = vcombine.high %v938_v26, %v970_v28 }
 0x216   :  { %3271 = vmatprep.mubr.msk.f32.mxu1 %vm3477_vm1, %v3476_v48  ;;  %3279 = vmatprep.subr.mxu1 %v3476_v48 }
 0x217   :  { %3276 = vmatprep.mubr.msk.f32.mxu0 %vm3477_vm1, %v3476_v48  ;;  %3284 = vmatprep.subr.mxu0 %v3476_v48 }
 0x218   :  { %3277 = vmatmul.mubr.msk.f32.vlgmr.msra.gmra.mxu0 %vm1111_vm2, %v987_v25  ;;  %3272 = vmatmul.mubr.msk.f32.vlgmr.msra.gmra.mxu1 %vm1111_vm2, %v786_v29 }
 0x219   :  { %3285 = vmatpush3.xpose.msk.msra.mxu0 %vm1111_vm2, %v993_v30  ;;  %3280 = vmatpush3.xpose.msk.msra.mxu1 %vm1111_vm2, %v992_v31 }
 0x21a   :  { %3281 = vmatprep.mubr.msk.f32.mxu1 %vm3477_vm1, %v3476_v48  ;;  %3289 = vmatprep.subr.mxu1 %v3476_v48 }
 0x21b   :  { %3286 = vmatprep.mubr.msk.f32.mxu0 %vm3477_vm1, %v3476_v48  ;;  %3294 = vmatprep.subr.mxu0 %v3476_v48 }
 0x21c   :  { %3287 = vmatmul.mubr.msk.f32.vlgmr.msra.gmra.mxu0 %vm1111_vm2, %v989_v33  ;;  %3282 = vmatmul.mubr.msk.f32.vlgmr.msra.gmra.mxu1 %vm1111_vm2, %v988_v32 }
 0x21d   :  { %3296 = vmatprep.mubr.msk.f32.mxu0 %vm3477_vm1, %v3476_v48  ;;  %3290 = vmatpush3.xpose.msk.msra.mxu1 %vm1111_vm2, %v994_v34 }
 0x21e   :  { %3291 = vmatprep.mubr.msk.f32.mxu1 %vm3477_vm1, %v3476_v48  ;;  %3299 = vmatprep.subr.mxu1 %v3476_v48 }
 0x220   :  { %3292 = vmatmul.mubr.msk.f32.vlgmr.msra.gmra.mxu1 %vm1111_vm2, %v990_v35 }
 0x221   :  { %3301 = vmatprep.mubr.msk.f32.mxu1 %vm3477_vm1, %v3476_v48 }
 0x2d0   :  { %v1184_v37 = vpop.f32.mrf.mxu1 }
 0x2d1   :  { %v1185_v38 = vadd.f32 %v3140_v36, %v1184_v37 }
 0x2d2   :  { %v3258_v44 = vpop.f32.mrf.mxu1 }
 0x2d3   :  { %v1720_v51 = vsel %vm1111_vm2, %v1185_v38, -inf }
 0x2d4   :  { %v1336_v50 = vpop.f32.mrf.mxu0  ;;  %1721 = vmax.xlane.f32.xlu0 %v1720_v51  ;;  %v1260_v53 = vpop.f32.mrf.mxu1 }
 0x2d5   :  { %v1337_v52 = vadd.f32 %v3142_v43, %v1336_v50  ;;  %v1261_v55 = vadd.f32 %v3141_v46, %v1260_v53 }
 0x2d6   :  { %v3268_v54 = vpop.f32.mrf.mxu0  ;;  %v3263_v56 = vpop.f32.mrf.mxu1 }
 0x2d7   :  { %v1726_v59 = vsel %vm1111_vm2, %v1337_v52, -inf  ;;  %v1723_v60 = vsel %vm1111_vm2, %v1261_v55, -inf }
 0x2d8   :  { %v1488_v62 = vpop.f32.mrf.mxu0  ;;  %1727 = vmax.xlane.f32.xlu0 %v1726_v59  ;;  %1724 = vmax.xlane.f32.xlu1 %v1723_v60  ;;  %v1412_v63 = vpop.f32.mrf.mxu1 }
 0x2d9   :  { %v1413_v0 = vadd.f32 %v3143_v57, %v1412_v63  ;;  %v1489_v5 = vadd.f32 %v3144_v58, %v1488_v62 }
 0x2da   :  { %v3278_v6 = vpop.f32.mrf.mxu0  ;;  %v3273_v49 = vpop.f32.mrf.mxu1 }
 0x2db   :  { %v1729_v9 = vsel %vm1111_vm2, %v1413_v0, -inf  ;;  %v1732_v39 = vsel %vm1111_vm2, %v1489_v5, -inf }
 0x2dc   :  { %v1640_v11 = vpop.f32.mrf.mxu0  ;;  %1730 = vmax.xlane.f32.xlu0 %v1729_v9  ;;  %v1564_v12 = vpop.f32.mrf.mxu1 }
 0x2dd   :  { %v1641_v40 = vadd.f32 %v3146_v8, %v1640_v11  ;;  %v3790_v16 = vadd.f32 %v3145_v15, %v1564_v12 }
 0x2de   :  { %v3288_v41 = vpop.f32.mrf.mxu0  ;;  %v3283_v42 = vpop.f32.mrf.mxu1 }
 0x2df   :  { %v1738_v13 = vsel %vm1111_vm2, %v1641_v40, -inf  ;;  %v1735_v1 = vsel %vm1111_vm2, %v3790_v16, -inf }
 0x2e0   :  { %v1716_v10 = vpop.f32.mrf.mxu1  ;;  %1733 = vmax.xlane.f32.xlu0 %v1732_v39 }
 0x2e1   :  { %v3795_v18 = vadd.f32 %v3147_v17, %v1716_v10 }
 0x2e2   :  { %v3293_v14 = vpop.f32.mrf.mxu1 }
 0x2e4   :  { %1739 = vmax.xlane.f32.xlu0 %v1738_v13 }
 0x2e9   :  { %229 = vrot.lane.b32.xlu1 %v3576_v47, %s3480_s2 }
 0x2ed   :  { %235 = vrot.lane.b32.xlu1 %v3576_v47, %s3481_s21 }
 0x2f1   :  { %241 = vrot.lane.b32.xlu1 %v3576_v47, %s3482_s22 }
 0x2fa   :  { %223 = vrot.lane.b32.xlu0 %v3576_v47, %s3483_s23  ;;  %v1741_v47 = vsel %vm1111_vm2, %v3795_v18, -inf }
 0x2fe   :  { %225 = vrot.lane.b32.xlu0 %v3574_v45, %s3483_s23 }
 0x315   :  { %1736 = vmax.xlane.f32.xlu1 %v1735_v1 }
 0x319   :  { %1742 = vmax.xlane.f32.xlu1 %v1741_v47 }
 0x32a   :  { %231 = vrot.lane.b32.xlu1 %v3574_v45, %s3480_s2 }
 0x35d   :  { %v1722_v2 = vpop.xlane.xlu0 %1721 }
 0x35e   :  { %v1744_v4 = vsub.f32 %v1185_v38, %v1722_v2 }
 0x360   :  { %v1752_v7 = vmul.f32 1.442695, %v1744_v4 }
 0x361   :  { %v1725_v19 = vpop.xlane.xlu1 %1724  ;;  %v1728_v22 = vpop.xlane.xlu0 %1727 }
 0x362   :  { %3400 = vpow2.f32 %v1752_v7  ;;  %v1745_v20 = vsub.f32 %v1261_v55, %v1725_v19  ;;  %v1746_v21 = vsub.f32 %v1337_v52, %v1728_v22 }
 0x364   :  { %v1754_v23 = vmul.f32 1.442695, %v1745_v20  ;;  %v1756_v24 = vmul.f32 1.442695, %v1746_v21 }
 0x365   :  { %v230_v25 = vpop.permute.xlu1 %229  ;;  %v1731_v26 = vpop.xlane.xlu0 %1730 }
 0x366   :  { %3402 = vpow2.f32 %v1754_v23  ;;  %v1747_v28 = vsub.f32 %v1413_v0, %v1731_v26 }
 0x367   :  { %3404 = vpow2.f32 %v1756_v24 }
 0x368   :  { %v1758_v29 = vmul.f32 1.442695, %v1747_v28 }
 0x369   :  { %v236_v30 = vpop.permute.xlu1 %235  ;;  %v1734_v31 = vpop.xlane.xlu0 %1733 }
 0x36a   :  { %3406 = vpow2.f32 %v1758_v29  ;;  %v1748_v32 = vsub.f32 %v1489_v5, %v1734_v31 }
 0x36c   :  { %v1760_v33 = vmul.f32 1.442695, %v1748_v32 }
 0x36d   :  { %v242_v34 = vpop.permute.xlu1 %241  ;;  %v1740_v35 = vpop.xlane.xlu0 %1739 }
 0x36e   :  { %3408 = vpow2.f32 %v1760_v33  ;;  %v1750_v36 = vsub.f32 %v1641_v40, %v1740_v35  ;;  %v399_v38 = vcombine.low %v230_v25, %v242_v34  ;;  %v400_v43 = vcombine.high %v230_v25, %v242_v34 }
 0x36f   :  { %v3802_v37 = vpop.eup %3400 }
 0x370   :  { %v1764_v44 = vmul.f32 1.442695, %v1750_v36  ;;  %v1768_v46 = vsel %vm1111_vm2, %v3802_v37, 0.0  ;;  %v407_v54 = vrot.slane %v399_v38, %v3601_v61  ;;  %v414_v56 = vrot.slane %v400_v43, %v3601_v61 }
 0x371   :  { %1769 = vadd.xlane.f32.xlu0 %v1768_v46  ;;  %v224_v50 = vpop.permute.xlu0 %223 }
 0x372   :  { %3410 = vpow2.f32 %v1764_v44  ;;  %v383_v51 = vcombine.low %v224_v50, %v236_v30  ;;  %v384_v52 = vcombine.high %v224_v50, %v236_v30 }
 0x373   :  { %v3806_v53 = vpop.eup %3402 }
 0x374   :  { %v3809_v55 = vpop.eup %3404  ;;  %v391_v57 = vrot.slane %v383_v51, %v3601_v61  ;;  %v398_v58 = vrot.slane %v384_v52, %v3601_v61  ;;  %v1771_v59 = vsel %vm1111_vm2, %v3806_v53, 0.0 }
 0x375   :  { %1772 = vadd.xlane.f32.xlu1 %v1771_v59  ;;  %v1774_v60 = vsel %vm1111_vm2, %v3809_v55, 0.0 }
 0x376   :  { %v415_v62 = vcombine.low %v391_v57, %v407_v54  ;;  %v416_v63 = vcombine.high %v391_v57, %v407_v54  ;;  %v431_v0 = vcombine.low %v398_v58, %v414_v56  ;;  %v432_v5 = vcombine.high %v398_v58, %v414_v56  ;;  %1775 = vadd.xlane.f32.xlu0 %v1774_v60 }
 0x377   :  { %v3818_v6 = vpop.eup %3406 }
 0x378   :  { %v423_v49 = vrot.slane %v415_v62, %v3604_v3  ;;  %v430_v8 = vrot.slane %v416_v63, %v3604_v3  ;;  %v439_v9 = vrot.slane %v431_v0, %v3604_v3  ;;  %v446_v11 = vrot.slane %v432_v5, %v3604_v3 }
 0x379   :  { %v1777_v12 = vsel %vm1111_vm2, %v3818_v6, 0.0 }
 0x37a   :  { %v791_v39 = vcombine.low %v423_v49, %v430_v8  ;;  %v3128_v40 = vcombine.high %v423_v49, %v430_v8  ;;  %v807_v41 = vcombine.low %v439_v9, %v446_v11  ;;  %v3129_v42 = vcombine.high %v439_v9, %v446_v11  ;;  %1778 = vadd.xlane.f32.xlu1 %v1777_v12 }
 0x37b   :  { %v3826_v10 = vpop.eup %3408 }
 0x37c   :  { %v798_v13 = vrot.slane %v791_v39, %v3601_v61  ;;  %v806_v14 = vrot.slane %v3128_v40, %v3601_v61  ;;  %v814_v15 = vrot.slane %v807_v41, %v3601_v61  ;;  %v822_v17 = vrot.slane %v3129_v42, %v3601_v61 }
 0x37d   :  { %v1780_v1 = vsel %vm1111_vm2, %v3826_v10, 0.0 }
 0x37e   :  { %1781 = vadd.xlane.f32.xlu0 %v1780_v1  ;;  %v823_v47 = vcombine.low %v798_v13, %v806_v14  ;;  %v839_v2 = vcombine.low %v814_v15, %v822_v17  ;;  %v824_v4 = vcombine.high %v798_v13, %v806_v14  ;;  %v840_v7 = vcombine.high %v814_v15, %v822_v17 }
 0x37f   :  { %v3834_v19 = vpop.eup %3410 }
 0x380   :  { %v1786_v22 = vsel %vm1111_vm2, %v3834_v19, 0.0  ;;  %v831_v20 = vrot.slane %v823_v47, %v3604_v3  ;;  %v847_v21 = vrot.slane %v839_v2, %v3604_v3  ;;  %v838_v23 = vrot.slane %v824_v4, %v3604_v3 }
 0x381   :  { %v854_v24 = vrot.slane %v840_v7, %v3604_v3 }
 0x382   :  { %1787 = vadd.xlane.f32.xlu0 %v1786_v22  ;;  %v855_v25 = vcombine.low %v831_v20, %v847_v21  ;;  %v856_v26 = vcombine.high %v831_v20, %v847_v21 }
 0x383   :  { %v857_v28 = vcombine.low %v838_v23, %v854_v24  ;;  %v858_v29 = vcombine.high %v838_v23, %v854_v24 }
 0x384   :  { %3295 = vmatpush3.msra.mxu0 %v855_v25  ;;  %3300 = vmatpush3.msra.mxu1 %v856_v26 }
 0x385   :  { %3304 = vmatprep.subr.mxu0 %v3476_v48  ;;  %3309 = vmatprep.subr.mxu1 %v3476_v48 }
 0x398   :  { %237 = vrot.lane.b32.xlu0 %v3574_v45, %s3481_s21 }
 0x39e   :  { %v1737_v30 = vpop.xlane.xlu1 %1736 }
 0x39f   :  { %v1749_v31 = vsub.f32 %v3790_v16, %v1737_v30  ;;  %v226_v16 = vpop.permute.xlu0 %225 }
 0x3a1   :  { %v1762_v32 = vmul.f32 1.442695, %v1749_v31 }
 0x3a2   :  { %v1743_v33 = vpop.xlane.xlu1 %1742 }
 0x3a3   :  { %3412 = vpow2.f32 %v1762_v32  ;;  %v1751_v34 = vsub.f32 %v3795_v18, %v1743_v33 }
 0x3a5   :  { %v1766_v35 = vmul.f32 1.442695, %v1751_v34 }
 0x3a6   :  { %v232_v46 = vpop.permute.xlu1 %231 }
 0x3a7   :  { %3414 = vpow2.f32 %v1766_v35 }
 0x3b0   :  { %v3848_v36 = vpop.eup %3412 }
 0x3b1   :  { %v1783_v38 = vsel %vm1111_vm2, %v3848_v36, 0.0 }
 0x3b2   :  { %1784 = vadd.xlane.f32.xlu1 %v1783_v38 }
 0x3b4   :  { %v3852_v43 = vpop.eup %3414 }
 0x3b5   :  { %v1789_v44 = vsel %vm1111_vm2, %v3852_v43, 0.0 }
 0x3b6   :  { %1790 = vadd.xlane.f32.xlu1 %v1789_v44 }
 0x3c7   :  { %243 = vrot.lane.b32.xlu1 %v3574_v45, %s3482_s22 }
 0x3fa   :  { %v1770_v18 = vpop.xlane.xlu0 %1769 }
 0x3fb   :  { %3416 = vrcp.f32 %v1770_v18 }
 0x3fe   :  { %v1773_v50 = vpop.xlane.xlu1 %1772 }
 0x3ff   :  { %3418 = vrcp.f32 %v1773_v50  ;;  %v1776_v51 = vpop.xlane.xlu0 %1775 }
 0x400   :  { %3420 = vrcp.f32 %v1776_v51 }
 0x403   :  { %v1779_v52 = vpop.xlane.xlu1 %1778 }
 0x404   :  { %3422 = vrcp.f32 %v1779_v52 }
 0x408   :  { %v3417_v54 = vpop.eup %3416 }
 0x409   :  { %v1800_v56 = vmul.f32 %v3417_v54, %v1770_v18 }
 0x40b   :  { %v1808_v57 = vsub.f32 2.0, %v1800_v56 }
 0x40c   :  { %v3419_v58 = vpop.eup %3418 }
 0x40d   :  { %v3421_v59 = vpop.eup %3420  ;;  %v1816_v60 = vmul.f32 %v3417_v54, %v1808_v57  ;;  %v1801_v62 = vmul.f32 %v3419_v58, %v1773_v50 }
 0x40e   :  { %v1802_v63 = vmul.f32 %v3421_v59, %v1776_v51 }
 0x40f   :  { %v1824_v45 = vmul.f32 %v3802_v37, %v1816_v60  ;;  %v1809_v0 = vsub.f32 2.0, %v1801_v62 }
 0x410   :  { %v1810_v5 = vsub.f32 2.0, %v1802_v63 }
 0x411   :  { %v3423_v49 = vpop.eup %3422  ;;  %v1817_v8 = vmul.f32 %v3419_v58, %v1809_v0  ;;  %3297 = vmatmul.mubr.msk.f32.vlgmr.msra.gmra.mxu0 %vm1111_vm2, %v1824_v45 }
 0x412   :  { %v1818_v9 = vmul.f32 %v3421_v59, %v1810_v5  ;;  %v1803_v11 = vmul.f32 %v3423_v49, %v1779_v52  ;;  %3305 = vmatpush3.msra.mxu0 %v857_v28  ;;  %3306 = vmatprep.mubr.msk.f32.mxu0 %vm3477_vm1, %v3476_v48 }
 0x413   :  { %v1825_v12 = vmul.f32 %v3806_v53, %v1817_v8  ;;  %3314 = vmatprep.subr.mxu0 %v3476_v48 }
 0x414   :  { %v1826_v39 = vmul.f32 %v3809_v55, %v1818_v9  ;;  %v1811_v40 = vsub.f32 2.0, %v1803_v11  ;;  %v1782_v55 = vpop.xlane.xlu0 %1781 }
 0x415   :  { %3302 = vmatmul.mubr.msk.f32.vlgmr.msra.gmra.mxu1 %vm1111_vm2, %v1825_v12  ;;  %3424 = vrcp.f32 %v1782_v55 }
 0x416   :  { %v1819_v37 = vmul.f32 %v3423_v49, %v1811_v40  ;;  %3307 = vmatmul.mubr.msk.f32.vlgmr.msra.gmra.mxu0 %vm1111_vm2, %v1826_v39  ;;  %3310 = vmatpush3.msra.mxu1 %v858_v29 }
 0x417   :  { %3311 = vmatprep.mubr.msk.f32.mxu1 %vm3477_vm1, %v3476_v48  ;;  %3319 = vmatprep.subr.mxu1 %v3476_v48 }
 0x418   :  { %v1827_v53 = vmul.f32 %v3818_v6, %v1819_v37  ;;  %3316 = vmatprep.mubr.msk.f32.mxu0 %vm3477_vm1, %v3476_v48  ;;  %v1788_v41 = vpop.xlane.xlu0 %1787 }
 0x41a   :  { %3312 = vmatmul.mubr.msk.f32.vlgmr.msra.gmra.mxu1 %vm1111_vm2, %v1827_v53 }
 0x41b   :  { %3321 = vmatprep.mubr.msk.f32.mxu1 %vm3477_vm1, %v3476_v48 }
 0x41c   :  { %v238_v13 = vpop.permute.xlu0 %237 }
 0x41d   :  { %v587_v15 = vcombine.low %v226_v16, %v238_v13  ;;  %v588_v17 = vcombine.high %v226_v16, %v238_v13 }
 0x41f   :  { %v595_v4 = vrot.slane %v587_v15, %v3601_v61  ;;  %v602_v7 = vrot.slane %v588_v17, %v3601_v61 }
 0x422   :  { %v3425_v2 = vpop.eup %3424 }
 0x423   :  { %v1804_v28 = vmul.f32 %v3425_v2, %v1782_v55 }
 0x425   :  { %v1812_v16 = vsub.f32 2.0, %v1804_v28 }
 0x427   :  { %v1820_v62 = vmul.f32 %v3425_v2, %v1812_v16 }
 0x429   :  { %v1828_v37 = vmul.f32 %v3826_v10, %v1820_v62 }
 0x43b   :  { %v1785_v42 = vpop.xlane.xlu1 %1784 }
 0x43c   :  { %3426 = vrcp.f32 %v1785_v42 }
 0x43d   :  { %3428 = vrcp.f32 %v1788_v41 }
 0x43f   :  { %v1791_v14 = vpop.xlane.xlu1 %1790 }
 0x440   :  { %3430 = vrcp.f32 %v1791_v14 }
 0x443   :  { %v244_v6 = vpop.permute.xlu1 %243 }
 0x444   :  { %v603_v1 = vcombine.low %v232_v46, %v244_v6  ;;  %v604_v47 = vcombine.high %v232_v46, %v244_v6 }
 0x446   :  { %v611_v22 = vrot.slane %v603_v1, %v3601_v61  ;;  %v618_v20 = vrot.slane %v604_v47, %v3601_v61 }
 0x448   :  { %v619_v21 = vcombine.low %v595_v4, %v611_v22  ;;  %v620_v23 = vcombine.high %v595_v4, %v611_v22  ;;  %v635_v24 = vcombine.low %v602_v7, %v618_v20  ;;  %v636_v25 = vcombine.high %v602_v7, %v618_v20 }
 0x449   :  { %v3427_v26 = vpop.eup %3426 }
 0x44a   :  { %v3429_v29 = vpop.eup %3428  ;;  %v1805_v30 = vmul.f32 %v3427_v26, %v1785_v42  ;;  %v627_v31 = vrot.slane %v619_v21, %v3604_v3  ;;  %v634_v32 = vrot.slane %v620_v23, %v3604_v3  ;;  %v643_v33 = vrot.slane %v635_v24, %v3604_v3 }
 0x44b   :  { %v650_v34 = vrot.slane %v636_v25, %v3604_v3  ;;  %v1806_v46 = vmul.f32 %v3429_v29, %v1788_v41 }
 0x44c   :  { %v995_v35 = vcombine.low %v627_v31, %v634_v32  ;;  %v3138_v38 = vcombine.high %v627_v31, %v634_v32  ;;  %v1813_v51 = vsub.f32 2.0, %v1805_v30 }
 0x44d   :  { %v3431_v44 = vpop.eup %3430  ;;  %v1011_v18 = vcombine.low %v643_v33, %v650_v34  ;;  %v3139_v50 = vcombine.high %v643_v33, %v650_v34  ;;  %v1814_v0 = vsub.f32 2.0, %v1806_v46 }
 0x44e   :  { %v1807_v52 = vmul.f32 %v3431_v44, %v1791_v14  ;;  %v1002_v54 = vrot.slane %v995_v35, %v3601_v61  ;;  %v1010_v56 = vrot.slane %v3138_v38, %v3601_v61  ;;  %v1821_v5 = vmul.f32 %v3427_v26, %v1813_v51 }
 0x44f   :  { %v1018_v57 = vrot.slane %v1011_v18, %v3601_v61  ;;  %v1026_v58 = vrot.slane %v3139_v50, %v3601_v61  ;;  %v1822_v53 = vmul.f32 %v3429_v29, %v1814_v0 }
 0x450   :  { %v1027_v59 = vcombine.low %v1002_v54, %v1010_v56  ;;  %v1028_v60 = vcombine.high %v1002_v54, %v1010_v56  ;;  %v1815_v49 = vsub.f32 2.0, %v1807_v52  ;;  %v1829_v55 = vmul.f32 %v3848_v36, %v1821_v5 }
 0x451   :  { %v1043_v63 = vcombine.low %v1018_v57, %v1026_v58  ;;  %v1044_v45 = vcombine.high %v1018_v57, %v1026_v58  ;;  %v1830_v14 = vmul.f32 %v3834_v19, %v1822_v53 }
 0x452   :  { %v1035_v8 = vrot.slane %v1027_v59, %v3604_v3  ;;  %v1042_v11 = vrot.slane %v1028_v60, %v3604_v3  ;;  %v1823_v41 = vmul.f32 %v3431_v44, %v1815_v49 }
 0x453   :  { %v1051_v9 = vrot.slane %v1043_v63, %v3604_v3  ;;  %v1058_v12 = vrot.slane %v1044_v45, %v3604_v3 }
 0x454   :  { %v1831_v10 = vmul.f32 %v3852_v43, %v1823_v41 }
 0x455   :  { %v1059_v39 = vcombine.low %v1035_v8, %v1051_v9  ;;  %v1060_v40 = vcombine.high %v1035_v8, %v1051_v9  ;;  %v1061_v42 = vcombine.low %v1042_v11, %v1058_v12  ;;  %v1062_v13 = vcombine.high %v1042_v11, %v1058_v12 }
 0x457   :  { %3315 = vmatpush3.msra.mxu0 %v1059_v39  ;;  %3320 = vmatpush3.msra.mxu1 %v1060_v40 }
 0x458   :  { %3317 = vmatmul.mubr.msk.f32.vlgmr.msra.gmra.mxu0 %vm1111_vm2, %v1828_v37  ;;  %3322 = vmatmul.mubr.msk.f32.vlgmr.msra.gmra.mxu1 %vm1111_vm2, %v1829_v55 }
 0x459   :  { %3324 = vmatprep.subr.mxu0 %v3476_v48  ;;  %3329 = vmatprep.subr.mxu1 %v3476_v48 }
 0x45a   :  { %3325 = vmatpush3.msra.mxu0 %v1061_v42  ;;  %3330 = vmatpush3.msra.mxu1 %v1062_v13 }
 0x45b   :  { %3326 = vmatprep.mubr.msk.f32.mxu0 %vm3477_vm1, %v3476_v48  ;;  %3331 = vmatprep.mubr.msk.f32.mxu1 %vm3477_vm1, %v3476_v48 }
 0x45c   :  { %3327 = vmatmul.mubr.msk.f32.vlgmr.msra.gmra.mxu0 %vm1111_vm2, %v1830_v14  ;;  %3332 = vmatmul.mubr.msk.f32.vlgmr.msra.gmra.mxu1 %vm1111_vm2, %v1831_v10 }
 0x4d1   :  { %v1901_v36 = vpop.f32.mrf.mxu0 }
 0x4d3   :  { %v3298_v15 = vpop.f32.mrf.mxu0 }
 0x4d5   :  { %v1974_v17 = vpop.f32.mrf.mxu1 }
 0x4d6   :  { %v2047_v6 = vpop.f32.mrf.mxu0 }
 0x4d7   :  { %v3303_v1 = vpop.f32.mrf.mxu1  ;;  %v2416_v47 = vcombine.low %v1901_v36, %v2047_v6  ;;  %v2417_v43 = vcombine.high %v1901_v36, %v2047_v6  ;;  %v2723_v6 = vld [vmem:[%s4059_s4 + $0x18] sm:$0xff] }
 0x4d8   :  { %v3308_v19 = vpop.f32.mrf.mxu0  ;;  %v2722_v1 = vld [vmem:[%s4059_s4 + $0x10] sm:$0xff]  ;;  %3334 = vmatprep.subr.mxu0 %v2723_v6 }
 0x4d9   :  { %v2424_v20 = vrot.slane %v2416_v47, %v3601_v61  ;;  %v2431_v48 = vrot.slane %v2417_v43, %v3601_v61  ;;  %3335 = vmatpush3.msra.mxu0 %v2723_v6 }
 0x4da   :  { %v2120_v2 = vpop.f32.mrf.mxu1  ;;  %3336 = vmatprep.subr.mxu0 %v2722_v1 }
 0x4db   :  { %v2432_v4 = vcombine.low %v1974_v17, %v2120_v2  ;;  %v2433_v7 = vcombine.high %v1974_v17, %v2120_v2  ;;  %3337 = vmatpush3.msra.mxu0 %v2722_v1 }
 0x4dc   :  { %v3313_v22 = vpop.f32.mrf.mxu1 }
 0x4dd   :  { %v2440_v21 = vrot.slane %v2432_v4, %v3601_v61  ;;  %v2447_v23 = vrot.slane %v2433_v7, %v3601_v61 }
 0x4df   :  { %v2448_v24 = vcombine.low %v2424_v20, %v2440_v21  ;;  %v2449_v25 = vcombine.high %v2424_v20, %v2440_v21  ;;  %v2464_v26 = vcombine.low %v2431_v48, %v2447_v23  ;;  %v2465_v28 = vcombine.high %v2431_v48, %v2447_v23  ;;  %v2721_v48 = vld [vmem:[%s4059_s4 + $0x8] sm:$0xff]  ;;  %v2720_v21 = vld [vmem:[%s4059_s4] sm:$0xff] }
 0x4e0   :  { %3338 = vmatprep.subr.mxu0 %v2721_v48 }
 0x4e1   :  { %v2456_v29 = vrot.slane %v2448_v24, %v3604_v3  ;;  %v2463_v30 = vrot.slane %v2449_v25, %v3604_v3  ;;  %v2472_v31 = vrot.slane %v2464_v26, %v3604_v3  ;;  %v2479_v32 = vrot.slane %v2465_v28, %v3604_v3  ;;  %3339 = vmatpush3.msra.mxu0 %v2721_v48 }
 0x4e2   :  { %3340 = vmatprep.subr.mxu0 %v2720_v21 }
 0x4e3   :  { %v2552_v33 = vcombine.low %v2456_v29, %v2463_v30  ;;  %v3172_v34 = vcombine.high %v2456_v29, %v2463_v30  ;;  %v2568_v35 = vcombine.low %v2472_v31, %v2479_v32  ;;  %v3173_v38 = vcombine.high %v2472_v31, %v2479_v32  ;;  %3341 = vmatpush3.msra.mxu0 %v2720_v21 }
 0x4e5   :  { %v2559_v44 = vrot.slane %v2552_v33, %v3601_v61  ;;  %v2567_v16 = vrot.slane %v3172_v34, %v3601_v61  ;;  %v2575_v46 = vrot.slane %v2568_v35, %v3601_v61  ;;  %v2583_v18 = vrot.slane %v3173_v38, %v3601_v61 }
 0x4e7   :  { %v2584_v50 = vcombine.low %v2559_v44, %v2567_v16  ;;  %v2600_v51 = vcombine.low %v2575_v46, %v2583_v18  ;;  %v2585_v52 = vcombine.high %v2559_v44, %v2567_v16  ;;  %v2601_v54 = vcombine.high %v2575_v46, %v2583_v18 }
 0x4e9   :  { %v3919_v56 = vrot.slane %v2584_v50, %v3604_v3  ;;  %v3922_v57 = vrot.slane %v2600_v51, %v3604_v3  ;;  %v2599_v59 = vrot.slane %v2585_v52, %v3604_v3  ;;  %v2615_v60 = vrot.slane %v2601_v54, %v3604_v3 }
 0x4eb   :  { %v2617_v58 = vcombine.high %v3919_v56, %v3922_v57  ;;  %v2616_v62 = vcombine.low %v3919_v56, %v3922_v57  ;;  %v2618_v63 = vcombine.low %v2599_v59, %v2615_v60  ;;  %v2619_v45 = vcombine.high %v2599_v59, %v2615_v60  ;;  %v3975_v56 = vld [vmem:[%s4060_s5] sm:$0x3f] }
 0x4ed   :  { %2690 = vrot.lane.b32.xlu0 %v2617_v58, %s3484_s1 }
 0x4f1   :  { %2698 = vrot.lane.b32.xlu0 %v2618_v63, %s3485_s3 }
 0x4f5   :  { %2706 = vrot.lane.b32.xlu0 %v2619_v45, %s3486_s28 }
 0x518   :  { %v2193_v0 = vpop.f32.mrf.mxu0  ;;  %v2266_v5 = vpop.f32.mrf.mxu1 }
 0x51a   :  { %v3318_v49 = vpop.f32.mrf.mxu0  ;;  %v3323_v8 = vpop.f32.mrf.mxu1 }
 0x51b   :  { %v3445_v8 = vld [vmem:[%s4055_s0 + $0x8] sm:$0xff] }
 0x51c   :  { %v2339_v9 = vpop.f32.mrf.mxu0  ;;  %v2412_v11 = vpop.f32.mrf.mxu1 }
 0x51d   :  { %v2484_v12 = vcombine.low %v2193_v0, %v2339_v9  ;;  %v2485_v39 = vcombine.high %v2193_v0, %v2339_v9  ;;  %v2500_v40 = vcombine.low %v2266_v5, %v2412_v11  ;;  %v2501_v37 = vcombine.high %v2266_v5, %v2412_v11 }
 0x51e   :  { %v3328_v53 = vpop.f32.mrf.mxu0  ;;  %v3333_v55 = vpop.f32.mrf.mxu1  ;;  %v2726_v0 = vsub.s32 4, %v3562_v27 }
 0x51f   :  { %v2492_v41 = vrot.slane %v2484_v12, %v3601_v61  ;;  %v2499_v42 = vrot.slane %v2485_v39, %v3601_v61  ;;  %v2508_v13 = vrot.slane %v2500_v40, %v3601_v61  ;;  %v2515_v14 = vrot.slane %v2501_v37, %v3601_v61  ;;  %v3446_v12 = vld [vmem:[%s4055_s0] sm:$0xff] }
 0x520   :  { %v2727_v57 = vrot.slane %v3975_v56, %v2726_v0 }
 0x521   :  { %v2516_v10 = vcombine.low %v2492_v41, %v2508_v13  ;;  %v2517_v36 = vcombine.high %v2492_v41, %v2508_v13  ;;  %v2532_v15 = vcombine.low %v2499_v42, %v2515_v14  ;;  %v2533_v17 = vcombine.high %v2499_v42, %v2515_v14  ;;  %v2856_v13 = vld [vmem:[%s4061_s6 + $0x18] sm:$0xff]  ;;  %v2855_v14 = vld [vmem:[%s4061_s6 + $0x10] sm:$0xff] }
 0x522   :  { %3345 = vmatprep.subr.mxu1 %v2856_v13 }
 0x523   :  { %v2524_v19 = vrot.slane %v2516_v10, %v3604_v3  ;;  %v2531_v47 = vrot.slane %v2517_v36, %v3604_v3  ;;  %v2540_v43 = vrot.slane %v2532_v15, %v3604_v3  ;;  %v2547_v2 = vrot.slane %v2533_v17, %v3604_v3  ;;  %3346 = vmatpush3.msra.mxu1 %v2856_v13  ;;  %v2854_v10 = vld [vmem:[%s4061_s6 + $0x8] sm:$0xff]  ;;  %v2853_v36 = vld [vmem:[%s4061_s6] sm:$0xff] }
 0x524   :  { %3347 = vmatprep.subr.mxu1 %v2855_v14 }
 0x525   :  { %v2620_v4 = vcombine.low %v2524_v19, %v2531_v47  ;;  %v3174_v7 = vcombine.high %v2524_v19, %v2531_v47  ;;  %v2636_v22 = vcombine.low %v2540_v43, %v2547_v2  ;;  %v3175_v20 = vcombine.high %v2540_v43, %v2547_v2  ;;  %3348 = vmatpush3.msra.mxu1 %v2855_v14 }
 0x526   :  { %3349 = vmatprep.subr.mxu1 %v2854_v10 }
 0x527   :  { %v2627_v23 = vrot.slane %v2620_v4, %v3601_v61  ;;  %v2635_v24 = vrot.slane %v3174_v7, %v3601_v61  ;;  %v2643_v25 = vrot.slane %v2636_v22, %v3601_v61  ;;  %v2651_v26 = vrot.slane %v3175_v20, %v3601_v61  ;;  %3350 = vmatpush3.msra.mxu1 %v2854_v10 }
 0x528   :  { %3351 = vmatprep.subr.mxu1 %v2853_v36 }
 0x529   :  { %v2652_v28 = vcombine.low %v2627_v23, %v2635_v24  ;;  %v2668_v29 = vcombine.low %v2643_v25, %v2651_v26  ;;  %v2653_v30 = vcombine.high %v2627_v23, %v2635_v24  ;;  %v2669_v31 = vcombine.high %v2643_v25, %v2651_v26  ;;  %3352 = vmatpush3.msra.mxu1 %v2853_v36 }
 0x52a   :  { %v2843_v23 = vsub.s32 2, %v3562_v27  ;;  %v2849_v24 = vsub.s32 3, %v3562_v27 }
 0x52b   :  { %v2660_v32 = vrot.slane %v2652_v28, %v3604_v3  ;;  %v2676_v33 = vrot.slane %v2668_v29, %v3604_v3  ;;  %v2667_v35 = vrot.slane %v2653_v30, %v3604_v3  ;;  %v2683_v38 = vrot.slane %v2669_v31, %v3604_v3 }
 0x52c   :  { %v2844_v26 = vrot.slane %v3975_v56, %v2843_v23  ;;  %v2850_v30 = vrot.slane %v3975_v56, %v2849_v24 }
 0x52d   :  { %v2685_v34 = vcombine.high %v2660_v32, %v2676_v33  ;;  %v2684_v44 = vcombine.low %v2660_v32, %v2676_v33  ;;  %v2686_v61 = vcombine.low %v2667_v35, %v2683_v38  ;;  %v2687_v16 = vcombine.high %v2667_v35, %v2683_v38 }
 0x52f   :  { %2692 = vrot.lane.b32.xlu1 %v2685_v34, %s3484_s1 }
 0x533   :  { %2700 = vrot.lane.b32.xlu1 %v2686_v61, %s3485_s3  ;;  %v3010_v61 = vld [vmem:[%s4063_s8 + $0x38] sm:$0xff] }
 0x534   :  { %3356 = vmatprep.subr.mxu0 %v3010_v61 }
 0x537   :  { %2708 = vrot.lane.b32.xlu1 %v2687_v16, %s3486_s28  ;;  %v3009_v16 = vld [vmem:[%s4063_s8 + $0x30] sm:$0xff] }
 0x55f   :  { %v2691_v46 = vpop.permute.xlu0 %2690 }
 0x560   :  { %v2712_v50 = vsel %vm1111_vm2, %v2616_v62, %v2691_v46  ;;  %v3008_v46 = vld [vmem:[%s4063_s8 + $0x28] sm:$0xff] }
 0x563   :  { %v2699_v18 = vpop.permute.xlu0 %2698 }
 0x564   :  { %v2715_v51 = vsel %vm2714_vm3, %v2712_v50, %v2699_v18  ;;  %v3007_v18 = vld [vmem:[%s4063_s8 + $0x20] sm:$0xff]  ;;  %v3006_v50 = vld [vmem:[%s4063_s8 + $0x18] sm:$0xff] }
 0x567   :  { %v2707_v3 = vpop.permute.xlu0 %2706 }
 0x568   :  { %v2718_v52 = vsel %vm2717_vm4, %v2715_v51, %v2707_v3  ;;  %v3005_v51 = vld [vmem:[%s4063_s8 + $0x10] sm:$0xff]  ;;  %v3004_v3 = vld [vmem:[%s4063_s8 + $0x8] sm:$0xff] }
 0x569   :  { %3342 = vmatprep.mubr.msk.f32.mxu0 %vm46_vm0, %v2718_v52  ;;  %v3003_v52 = vld [vmem:[%s4063_s8] sm:$0xff] }
 0x5a1   :  { %v2693_v54 = vpop.permute.xlu1 %2692 }
 0x5a2   :  { %v2713_v59 = vsel %vm1111_vm2, %v2684_v44, %v2693_v54  ;;  %v3178_v54 = vld [vmem:[%s4062_s7] ss:$0 sm:$0xff]  ;;  %s3488_s7 = smov [#allocation2]  }
 0x5a3   :  { %s3106_s8 = sshll.u32 %s3488_s7, 4  ;;  %s3107_s8 = int_to_ptr.vmem [resolvable:$true] %s3106_s8 }
 0x5a4   :  { %s3447_s20 = scalar_lea.vmem %s3107_s8, 256  ;;  %p3452_p1 = scmp.lt.s32.totalorder %s3107_s8, %s3107_s8 }
 0x5a5   :  { %v2701_v58 = vpop.permute.xlu1 %2700  ;;  %p3448_p0 = scmp.ne.s32.totalorder %s3107_s8, %s3447_s20  ;;  %p3453_p2 = scmp.lt.s32.totalorder %s3447_s20, %s3447_s20 }
 0x5a6   :  { %v2716_v60 = vsel %vm2714_vm3, %v2713_v59, %v2701_v58 }
 0x5a7   :  { %p3454_p3 = por %p3453_p2, %p3452_p1 }
 0x5a9   :  { %v2709_v63 = vpop.permute.xlu1 %2708  ;;  %p3455_p4 = pnand %p3454_p3, %p3448_p0 }
 0x5aa   :  { %v2719_v45 = vsel %vm2717_vm4, %v2716_v60, %v2709_v63 }
 0x5ab   :  { %3343 = vmatmul.mubr.msk.f32.vlgmr.msra.gmra.mxu0 %vm46_vm0, %v2719_v45 }
 0x5ac   :  { %3357 = vmatpush3.msra.mxu0 %v3010_v61 }
 0x5ad   :  { %3358 = vmatprep.subr.mxu0 %v3009_v16 }
 0x5ae   :  { %3359 = vmatpush3.msra.mxu0 %v3009_v16 }
 0x5af   :  { %3360 = vmatprep.subr.mxu0 %v3008_v46 }
 0x5b0   :  { %3361 = vmatpush3.msra.mxu0 %v3008_v46 }
 0x5b1   :  { %3362 = vmatprep.subr.mxu0 %v3007_v18 }
 0x5b2   :  { %3363 = vmatpush3.msra.mxu0 %v3007_v18 }
 0x5b3   :  { %3364 = vmatprep.subr.mxu0 %v3006_v50 }
 0x5b4   :  { %3365 = vmatpush3.msra.mxu0 %v3006_v50 }
 0x5b5   :  { %3366 = vmatprep.subr.mxu0 %v3005_v51 }
 0x5b6   :  { %3367 = vmatpush3.msra.mxu0 %v3005_v51 }
 0x5b7   :  { %3368 = vmatprep.subr.mxu0 %v3004_v3 }
 0x5b8   :  { %3369 = vmatpush3.msra.mxu0 %v3004_v3 }
 0x5b9   :  { %3370 = vmatprep.subr.mxu0 %v3003_v52 }
 0x5ba   :  { %3371 = vmatpush3.msra.mxu0 %v3003_v52 }
 0x66b   :  { %v3344_v62 = vpop.f32.mrf.mxu0 }
 0x66c   :  { %v2806_v5 = vadd.f32 %v3344_v62, %v2727_v57 }
 0x66d   :  { %v2800_v49 = vpop.f32.mrf.mxu0 }
 0x66e   :  { %v3981_v9 = vadd.f32 %v3445_v8, %v2806_v5  ;;  %v2801_v11 = vadd.f32 %v2800_v49, %v2727_v57 }
 0x670   :  { %v3986_v39 = vadd.f32 %v3446_v12, %v2801_v11  ;;  %v2816_v40 = vsel %vm46_vm0, %v3981_v9, 0.0  ;;  %v2812_v41 = vmul.f32 %v3981_v9, %v3981_v9 }
 0x671   :  { %2817 = vadd.xlane.f32.xlu1 %v2816_v40 }
 0x672   :  { %v2813_v37 = vsel %vm46_vm0, %v3986_v39, 0.0  ;;  %v2811_v53 = vmul.f32 %v3986_v39, %v3986_v39  ;;  %v2822_v42 = vsel %vm46_vm0, %v2812_v41, 0.0 }
 0x673   :  { %2814 = vadd.xlane.f32.xlu0 %v2813_v37 }
 0x674   :  { %v2819_v55 = vsel %vm46_vm0, %v2811_v53, 0.0 }
 0x677   :  { %2820 = vadd.xlane.f32.xlu0 %v2819_v55 }
 0x67b   :  { %2823 = vadd.xlane.f32.xlu0 %v2822_v42 }
 0x6fa   :  { %v2818_v6 = vpop.xlane.xlu1 %2817 }
 0x6fb   :  { %v2826_v19 = vmul.f32 0.03125, %v2818_v6 }
 0x6fc   :  { %v2815_v15 = vpop.xlane.xlu0 %2814 }
 0x6fd   :  { %v2825_v17 = vmul.f32 0.03125, %v2815_v15  ;;  %v2830_v7 = vmul.f32 %v2826_v19, %v2826_v19  ;;  %v2834_v31 = vsub.f32 %v3981_v9, %v2826_v19 }
 0x6ff   :  { %v2829_v47 = vmul.f32 %v2825_v17, %v2825_v17  ;;  %v2833_v25 = vsub.f32 %v3986_v39, %v2825_v17 }
 0x700   :  { %v2821_v1 = vpop.xlane.xlu0 %2820 }
 0x701   :  { %v2827_v43 = vmul.f32 0.03125, %v2821_v1 }
 0x703   :  { %v2831_v2 = vsub.f32 %v2827_v43, %v2829_v47 }
 0x704   :  { %v2824_v4 = vpop.xlane.xlu0 %2823 }
 0x705   :  { %v2835_v22 = vadd.f32 1e-06, %v2831_v2  ;;  %v2828_v20 = vmul.f32 0.03125, %v2824_v4 }
 0x707   :  { %3432 = vrsqrt.f32 %v2835_v22  ;;  %v2832_v48 = vsub.f32 %v2828_v20, %v2830_v7 }
 0x709   :  { %v2836_v21 = vadd.f32 1e-06, %v2832_v48 }
 0x70b   :  { %3434 = vrsqrt.f32 %v2836_v21 }
 0x714   :  { %v3433_v28 = vpop.eup %3432 }
 0x715   :  { %v2839_v29 = vmul.f32 %v3433_v28, %v2833_v25 }
 0x717   :  { %v2845_v32 = vmul.f32 %v2844_v26, %v2839_v29 }
 0x718   :  { %v3435_v33 = vpop.eup %3434 }
 0x719   :  { %v2840_v34 = vmul.f32 %v3435_v33, %v2834_v31  ;;  %v2851_v35 = vadd.f32 %v2850_v30, %v2845_v32 }
 0x71b   :  { %v2846_v38 = vmul.f32 %v2844_v26, %v2840_v34  ;;  %3353 = vmatprep.mubr.msk.f32.mxu1 %vm46_vm0, %v2851_v35  ;;  %v3487_v35 = vmov 1.0  }
 0x71d   :  { %v2852_v44 = vadd.f32 %v2850_v30, %v2846_v38 }
 0x71f   :  { %3354 = vmatmul.mubr.msk.f32.vlgmr.msra.gmra.mxu1 %vm46_vm0, %v2852_v44 }
 0x7df   :  { %v3355_v58 = vpop.f32.mrf.mxu1 }
 0x7e0   :  { %v2942_v59 = vadd.f32 %v3355_v58, %v3178_v54 }
 0x7e1   :  { %v2936_v60 = vpop.f32.mrf.mxu1 }
 0x7e2   :  { %v2948_v63 = vmul.f32 0.70710677, %v2942_v59  ;;  %v2937_v45 = vadd.f32 %v3178_v54, %v2936_v60  ;;  %v2946_v52 = vmul.f32 0.5, %v2942_v59  ;;  %v3013_v60 = vsub.s32 5, %v3562_v27 }
 0x7e4   :  { %v2954_v0 = vand.u32 2147483647, %v2948_v63  ;;  %v2947_v57 = vmul.f32 0.70710677, %v2937_v45  ;;  %vm2950_vm5 = vcmp.lt.f32.partialorder %v2948_v63, 0.0  ;;  %v2945_v51 = vmul.f32 0.5, %v2937_v45 }
 0x7e5   :  { %v2952_v38 = vsel %vm2950_vm5, -1.0, %v3487_v35  ;;  %v3014_v63 = vrot.slane %v3975_v56, %v3013_v60 }
 0x7e6   :  { %v2956_v62 = vmul.f32 0.3275911, %v2954_v0  ;;  %v2953_v5 = vand.u32 2147483647, %v2947_v57  ;;  %v2986_v12 = vsub.f32 0.0, %v2954_v0  ;;  %vm2949_vm6 = vcmp.lt.f32.partialorder %v2947_v57, 0.0 }
 0x7e7   :  { %v2951_v46 = vsel %vm2949_vm6, -1.0, %v3487_v35 }
 0x7e8   :  { %v2958_v49 = vadd.f32 1.0, %v2956_v62  ;;  %v2955_v8 = vmul.f32 0.3275911, %v2953_v5  ;;  %v2985_v53 = vsub.f32 0.0, %v2953_v5  ;;  %v2988_v42 = vmul.f32 %v2986_v12, %v2954_v0 }
 0x7ea   :  { %3436 = vrcp.f32 %v2958_v49  ;;  %v2957_v11 = vadd.f32 1.0, %v2955_v8  ;;  %v2987_v36 = vmul.f32 %v2985_v53, %v2953_v5  ;;  %v2991_v17 = vmul.f32 1.442695, %v2988_v42 }
 0x7ec   :  { %3438 = vrcp.f32 %v2957_v11  ;;  %v2989_v47 = vmul.f32 1.442695, %v2987_v36 }
 0x7ed   :  { %3440 = vpow2.f32 %v2991_v17 }
 0x7ee   :  { %3442 = vpow2.f32 %v2989_v47 }
 0x7f7   :  { %v3437_v40 = vpop.eup %3436 }
 0x7f8   :  { %v2962_v37 = vmul.f32 %v3437_v40, %v2958_v49 }
 0x7f9   :  { %v3439_v55 = vpop.eup %3438 }
 0x7fa   :  { %v2964_v41 = vsub.f32 2.0, %v2962_v37  ;;  %v2961_v13 = vmul.f32 %v3439_v55, %v2957_v11  ;;  %v3441_v29 = vpop.eup %3440 }
 0x7fb   :  { %v3443_v33 = vpop.eup %3442 }
 0x7fc   :  { %v2966_v14 = vmul.f32 %v3437_v40, %v2964_v41  ;;  %v2963_v10 = vsub.f32 2.0, %v2961_v13 }
 0x7fe   :  { %v2968_v15 = vmul.f32 1.0614054, %v2966_v14  ;;  %v2965_v6 = vmul.f32 %v3439_v55, %v2963_v10 }
 0x800   :  { %v2970_v1 = vadd.f32 -1.4531521, %v2968_v15  ;;  %v2967_v19 = vmul.f32 1.0614054, %v2965_v6 }
 0x802   :  { %v2972_v43 = vmul.f32 %v2970_v1, %v2966_v14  ;;  %v2969_v2 = vadd.f32 -1.4531521, %v2967_v19 }
 0x804   :  { %v2974_v4 = vadd.f32 1.4214138, %v2972_v43  ;;  %v2971_v7 = vmul.f32 %v2969_v2, %v2965_v6 }
 0x806   :  { %v2976_v22 = vmul.f32 %v2974_v4, %v2966_v14  ;;  %v2973_v20 = vadd.f32 1.4214138, %v2971_v7 }
 0x808   :  { %v2978_v48 = vadd.f32 -0.28449672, %v2976_v22  ;;  %v2975_v21 = vmul.f32 %v2973_v20, %v2965_v6 }
 0x80a   :  { %v2980_v23 = vmul.f32 %v2978_v48, %v2966_v14  ;;  %v2977_v24 = vadd.f32 -0.28449672, %v2975_v21 }
 0x80c   :  { %v2982_v25 = vadd.f32 0.2548296, %v2980_v23  ;;  %v2979_v26 = vmul.f32 %v2977_v24, %v2965_v6 }
 0x80e   :  { %v2984_v28 = vmul.f32 %v2982_v25, %v2966_v14  ;;  %v2981_v30 = vadd.f32 0.2548296, %v2979_v26 }
 0x810   :  { %v2994_v31 = vmul.f32 %v3441_v29, %v2984_v28  ;;  %v2983_v32 = vmul.f32 %v2981_v30, %v2965_v6 }
 0x812   :  { %v2996_v34 = vsub.f32 1.0, %v2994_v31  ;;  %v2993_v44 = vmul.f32 %v3443_v33, %v2983_v32 }
 0x814   :  { %v2998_v61 = vmul.f32 %v2996_v34, %v2952_v38  ;;  %v2995_v16 = vsub.f32 1.0, %v2993_v44 }
 0x816   :  { %v2997_v18 = vmul.f32 %v2995_v16, %v2951_v46  ;;  %v3000_v50 = vadd.f32 1.0, %v2998_v61 }
 0x818   :  { %v2999_v3 = vadd.f32 1.0, %v2997_v18  ;;  %v3002_v58 = vmul.f32 %v3000_v50, %v2946_v52 }
 0x81a   :  { %v3001_v54 = vmul.f32 %v2999_v3, %v2945_v51 }
 0x81c   :  { %3372 = vmatprep.mubr.msk.f32.mxu0 %vm3015_vm7, %v3001_v54 }
 0x81d   :  { %3373 = vmatmul.mubr.msk.f32.vlgmr.msra.gmra.mxu0 %vm3015_vm7, %v3002_v58 }
 0x8dd   :  { %v3374_v0 = vpop.f32.mrf.mxu0 }
 0x8de   :  { %v3094_v57 = vadd.f32 %v3374_v0, %v3014_v63 }
 0x8df   :  { %v3088_v62 = vpop.f32.mrf.mxu0 }
 0x8e0   :  { %v3098_v5 = vadd.f32 %v3094_v57, %v3981_v9  ;;  %v3089_v49 = vadd.f32 %v3088_v62, %v3014_v63 }
 0x8e2   :  { %3100 = vst.msk [vmem:[#allocation2 + $0x8] sm:$0xff] %vm46_vm0, %v3098_v5  ;;  %v3097_v59 = vadd.f32 %v3089_v49, %v3986_v39 }
 0x8e4   :  { %3099 = vst.msk [vmem:[#allocation2] sm:$0xff] %vm46_vm0, %v3097_v59 }
 0x8e5   :  { %3458 = shalt.err (!%p3455_p4)
}
 0x8e6   :  { %s3489_s0 = smov 128  }
 0x8e7   :  { %3112 = dma.vmem_to_hbm [thread:$0]  %s3107_s8, 256, %s4064_s9, [#allocation3], %s3489_s0, %s3489_s0, %s3484_s1  }
 0x8e8   :  { %3467 = dma.done.wait [#allocation3], 256  }
 0x8e9   :  { %3468 = vsyncadd [#allocation3], 4294967040 }
 0x8ea   :  { %3116 = vsyncpa [#allocation3], 1 }

</bundles_post_ra>
